<compile_context>
chip_gen: v7x
topology: tpu7x:2x2x1
jax: 0.10.0
libtpu: 0.0.40
codegen_flags: <defaults>
</compile_context>

<pallas_src>
import jax
import jax.numpy as jnp
from jax import lax
from jax.experimental import pallas as pl
from jax.experimental.pallas import tpu as pltpu


def pct_attn_kernel(x_ref, wqkvT_ref, bv_ref, wtT_ref, bt_ref,
                    attn_ref, t_ref, tsum_ref, tsq_ref):
    """Per-batch: fused qkv projection, attention, trans_conv, BN partial stats."""
    xb = x_ref[0]                                   # (N, C)
    C = xb.shape[1]
    C4 = C // 4

    # Fused q/k/v projection: one MXU matmul, one weight DMA, wider output.
    qkv = jnp.dot(xb, wqkvT_ref[...], preferred_element_type=jnp.float32)  # (N, 2*C4+C)
    q = qkv[:, :C4]                                 # (N, C//4)
    k = qkv[:, C4:2 * C4]                           # (N, C//4)
    v = qkv[:, 2 * C4:] + bv_ref[0]                 # (N, C)

    # energy[i, j] = q[i, :] . k[j, :]   (contract last dims -> no k.T relayout)
    energy = lax.dot_general(q, k, (((1,), (1,)), ((), ())),
                             preferred_element_type=jnp.float32)           # (N, N)

    # softmax over j (numerically stable); EUP reciprocal instead of divide.
    m = jnp.max(energy, axis=-1, keepdims=True)
    p = jnp.exp(energy - m)
    attn = p * pl.reciprocal(jnp.sum(p, axis=-1, keepdims=True), approx=True)

    # attention / (1e-9 + attention.sum(dim=1, keepdims=True))  (sum over i)
    col_sum = jnp.sum(attn, axis=0, keepdims=True)                          # (1, N)
    attn = attn * pl.reciprocal(1e-9 + col_sum, approx=True)

    # x_r[j, c] = sum_n attn[n, j] * v[n, c]   (contract leading dims -> no attn.T)
    x_r = lax.dot_general(attn, v, (((0,), (0,)), ((), ())),
                          preferred_element_type=jnp.float32)               # (N, C)

    # trans_conv(x - x_r)
    t = jnp.dot(xb - x_r, wtT_ref[...], preferred_element_type=jnp.float32) + bt_ref[0]

    attn_ref[0] = attn
    t_ref[0] = t
    # Per-batch partial BatchNorm statistics so the BN pass needs no global reduce.
    tsum_ref[0] = jnp.sum(t, axis=0, keepdims=True)
    tsq_ref[0] = jnp.sum(t * t, axis=0, keepdims=True)


def pct_bn_kernel(x_ref, t_ref, scale_ref, shift_ref, out_ref):
    """out = x + relu(t * scale + shift); streamed over a (batch, row-tile) grid."""
    bn = t_ref[0] * scale_ref[...] + shift_ref[...]
    out_ref[0] = x_ref[0] + jnp.maximum(bn, 0.0)


def _pick_row_tile(rows):
    for tr in (512, 256, 128, 64, 32, 16, 8):
        if rows % tr == 0:
            return tr
    return rows  # full extent (always a legal block shape)


@jax.jit
def pct_forward(x, wqT, wkT, wvT, bv, wtT, bt, gamma, beta):
    B, N, C = x.shape
    C4 = C // 4
    w_qkv = jnp.concatenate([wqT, wkT, wvT], axis=1)            # (C, 2*C4 + C)

    attn, t, tsum, tsq = pl.pallas_call(
        pct_attn_kernel,
        out_shape=(
            jax.ShapeDtypeStruct((B, N, N), jnp.float32),
            jax.ShapeDtypeStruct((B, N, C), jnp.float32),
            jax.ShapeDtypeStruct((B, 1, C), jnp.float32),
            jax.ShapeDtypeStruct((B, 1, C), jnp.float32),
        ),
        grid=(B,),
        in_specs=[
            pl.BlockSpec((1, N, C), lambda b: (b, 0, 0)),
            pl.BlockSpec((C, 2 * C4 + C), lambda b: (0, 0)),
            pl.BlockSpec((1, C), lambda b: (0, 0)),
            pl.BlockSpec((C, C), lambda b: (0, 0)),
            pl.BlockSpec((1, C), lambda b: (0, 0)),
        ],
        out_specs=(
            pl.BlockSpec((1, N, N), lambda b: (b, 0, 0)),
            pl.BlockSpec((1, N, C), lambda b: (b, 0, 0)),
            pl.BlockSpec((1, 1, C), lambda b: (b, 0, 0)),
            pl.BlockSpec((1, 1, C), lambda b: (b, 0, 0)),
        ),
        compiler_params=pltpu.CompilerParams(
            dimension_semantics=("parallel",)),
    )(x, w_qkv, bv, wtT, bt)
    # TODO(synk): for large N on v7x (64 MiB VMEM) add a query-tile grid axis plus a
    # second pass for the column-sum renormalization and set vmem_limit_bytes.

    # Global (train-mode) BatchNorm1d stats from per-batch partial sums (one-pass var).
    count = jnp.float32(B * N)
    mean = jnp.sum(tsum[:, 0, :], axis=0, keepdims=True) / count            # (1, C)
    var = jnp.sum(tsq[:, 0, :], axis=0, keepdims=True) / count - mean * mean
    scale = gamma * lax.rsqrt(var + 1e-5)                                    # (1, C)
    shift = beta - mean * scale                                              # (1, C)

    # Lane-dense view (last dim 128) for the streaming BN + ReLU + residual pass.
    if (N * C) % 128 == 0 and 128 % C == 0:
        L = 128
        R = (N * C) // 128
        rep = 128 // C
        x_v = x.reshape(B, R, L)
        t_v = t.reshape(B, R, L)
        scale_v = jnp.tile(scale, (1, rep))
        shift_v = jnp.tile(shift, (1, rep))
    else:
        L, R = C, N
        x_v, t_v, scale_v, shift_v = x, t, scale, shift

    TR = _pick_row_tile(R)
    out = pl.pallas_call(
        pct_bn_kernel,
        out_shape=jax.ShapeDtypeStruct((B, R, L), jnp.float32),
        grid=(B, R // TR),
        in_specs=[
            pl.BlockSpec((1, TR, L), lambda b, r: (b, r, 0)),
            pl.BlockSpec((1, TR, L), lambda b, r: (b, r, 0)),
            pl.BlockSpec((1, L), lambda b, r: (0, 0)),
            pl.BlockSpec((1, L), lambda b, r: (0, 0)),
        ],
        out_specs=pl.BlockSpec((1, TR, L), lambda b, r: (b, r, 0)),
        compiler_params=pltpu.CompilerParams(
            dimension_semantics=("parallel", "parallel")),
    )(x_v, t_v, scale_v, shift_v)

    return out.reshape(B, N, C), attn


def pct_reference(x, wqT, wkT, wvT, bv, wtT, bt, gamma, beta):
    """Pure-JAX reference mirroring the PyTorch forward (BN in train mode)."""
    q = x @ wqT                                              # (B, N, C//4)
    k = x @ wkT                                              # (B, N, C//4)
    v = x @ wvT + bv[0]                                      # (B, N, C)
    energy = jnp.einsum('bid,bjd->bij', q, k)
    attn = jax.nn.softmax(energy, axis=-1)
    attn = attn / (1e-9 + jnp.sum(attn, axis=1, keepdims=True))
    x_r = jnp.einsum('bnj,bnc->bjc', attn, v)
    t = (x - x_r) @ wtT + bt[0]
    mean = jnp.mean(t, axis=(0, 1), keepdims=True)
    var = jnp.mean((t - mean) ** 2, axis=(0, 1), keepdims=True)
    bn = (t - mean) * lax.rsqrt(var + 1e-5) * gamma[0] + beta[0]
    out = x + jnp.maximum(bn, 0.0)
    return out, attn


if __name__ == "__main__":
    B, N, C = 2, 128, 32        # batch, points, channels (channels % 4 == 0)
    C4 = C // 4

    key = jax.random.PRNGKey(0)
    kx, kq, kk, kv, kbv, kt, kbt = jax.random.split(key, 7)

    x = jax.random.normal(kx, (B, N, C), dtype=jnp.float32)

    # Deterministic parameter init (fan-in scaled), stored pre-transposed so
    # kernels compute x @ W^T directly.
    s = 1.0 / jnp.sqrt(jnp.float32(C))
    wqT = jax.random.uniform(kq, (C, C4), jnp.float32, -s, s)   # q_conv.weight^T
    wkT = jax.random.uniform(kk, (C, C4), jnp.float32, -s, s)   # k_conv.weight^T
    wvT = jax.random.uniform(kv, (C, C), jnp.float32, -s, s)    # v_conv.weight^T
    bv = jax.random.uniform(kbv, (1, C), jnp.float32, -s, s)    # v_conv.bias
    wtT = jax.random.uniform(kt, (C, C), jnp.float32, -s, s)    # trans_conv.weight^T
    bt = jax.random.uniform(kbt, (1, C), jnp.float32, -s, s)    # trans_conv.bias
    gamma = jnp.ones((1, C), jnp.float32)                       # after_norm.weight
    beta = jnp.zeros((1, C), jnp.float32)                       # after_norm.bias

    out, attn = pct_forward(x, wqT, wkT, wvT, bv, wtT, bt, gamma, beta)
    out = jax.block_until_ready(out)
    attn = jax.block_until_ready(attn)

    ref_out, ref_attn = pct_reference(x, wqT, wkT, wvT, bv, wtT, bt, gamma, beta)

    assert out.shape == (B, N, C) and attn.shape == (B, N, N)
    # Tolerances allow for the approximate EUP reciprocals in the softmax/renorm.
    assert jnp.allclose(attn, ref_attn, atol=1e-3, rtol=1e-2)
    assert jnp.allclose(out, ref_out, atol=1e-2, rtol=1e-2)

    print("KERNEL_OK")
</pallas_src>

<mosaic_0001>
module attributes {stable_mosaic.version = 11 : i64} {
  func.func @pct_attn_kernel(%arg0: i32, %arg1: memref<1x128x32xf32, #tpu.memory_space<vmem>>, %arg2: memref<32x48xf32, #tpu.memory_space<vmem>>, %arg3: memref<1x32xf32, #tpu.memory_space<vmem>>, %arg4: memref<32x32xf32, #tpu.memory_space<vmem>>, %arg5: memref<1x32xf32, #tpu.memory_space<vmem>>, %arg6: memref<1x128x128xf32, #tpu.memory_space<vmem>>, %arg7: memref<1x128x32xf32, #tpu.memory_space<vmem>>, %arg8: memref<1x1x32xf32, #tpu.memory_space<vmem>>, %arg9: memref<1x1x32xf32, #tpu.memory_space<vmem>>) attributes {dimension_semantics = [#tpu.dimension_semantics<parallel>], iteration_bounds = array<i64: 2>, scalar_prefetch = 0 : i64, scratch_operands = 0 : i64, tpu.core_type = #tpu.core_type<tc>, window_params = [{transform_indices = @transform_0, window_bounds = array<i64: 1, 128, 32>}, {pipeline_mode = #tpu.pipeline_mode<synchronous>, transform_indices = @transform_1, window_bounds = array<i64: 32, 48>}, {pipeline_mode = #tpu.pipeline_mode<synchronous>, transform_indices = @transform_2, window_bounds = array<i64: 1, 32>}, {pipeline_mode = #tpu.pipeline_mode<synchronous>, transform_indices = @transform_3, window_bounds = array<i64: 32, 32>}, {pipeline_mode = #tpu.pipeline_mode<synchronous>, transform_indices = @transform_4, window_bounds = array<i64: 1, 32>}, {transform_indices = @transform_5, window_bounds = array<i64: 1, 128, 128>}, {transform_indices = @transform_6, window_bounds = array<i64: 1, 128, 32>}, {transform_indices = @transform_7, window_bounds = array<i64: 1, 1, 32>}, {transform_indices = @transform_8, window_bounds = array<i64: 1, 1, 32>}]} {
    %c0 = arith.constant 0 : index
    %c0_0 = arith.constant 0 : index
    %c0_1 = arith.constant 0 : index
    %0 = vector.load %arg1[%c0, %c0_0, %c0_1] : memref<1x128x32xf32, #tpu.memory_space<vmem>>, vector<1x128x32xf32>
    %1 = vector.shape_cast %0 : vector<1x128x32xf32> to vector<128x32xf32>
    %c0_2 = arith.constant 0 : index
    %c0_3 = arith.constant 0 : index
    %2 = vector.load %arg2[%c0_2, %c0_3] : memref<32x48xf32, #tpu.memory_space<vmem>>, vector<32x48xf32>
    %cst = arith.constant dense<0.000000e+00> : vector<128x48xf32>
    %3 = tpu.matmul %1, %2, %cst {dimension_numbers = #tpu.dot_dimension_numbers<[1], [0], [0], [1], [0, 0, 1, 1], [], []>} : vector<128x32xf32>, vector<32x48xf32>, vector<128x48xf32> -> vector<128x48xf32>
    %4 = vector.extract_strided_slice %3 {offsets = [0, 0], sizes = [128, 8], strides = [1, 1]} : vector<128x48xf32> to vector<128x8xf32>
    %5 = vector.extract_strided_slice %3 {offsets = [0, 8], sizes = [128, 8], strides = [1, 1]} : vector<128x48xf32> to vector<128x8xf32>
    %6 = vector.extract_strided_slice %3 {offsets = [0, 16], sizes = [128, 32], strides = [1, 1]} : vector<128x48xf32> to vector<128x32xf32>
    %c0_4 = arith.constant 0 : index
    %c0_5 = arith.constant 0 : index
    %7 = vector.load %arg3[%c0_4, %c0_5] : memref<1x32xf32, #tpu.memory_space<vmem>>, vector<1x32xf32>
    %8 = vector.shape_cast %7 : vector<1x32xf32> to vector<32xf32>
    %9 = vector.shape_cast %8 : vector<32xf32> to vector<1x32xf32>
    %10 = vector.broadcast %9 : vector<1x32xf32> to vector<128x32xf32>
    %11 = arith.addf %6, %10 : vector<128x32xf32>
    %cst_6 = arith.constant dense<0.000000e+00> : vector<128x128xf32>
    %12 = tpu.matmul %4, %5, %cst_6 {dimension_numbers = #tpu.dot_dimension_numbers<[1], [1], [0], [0], [0, 0, 1, 0], [], []>} : vector<128x8xf32>, vector<128x8xf32>, vector<128x128xf32> -> vector<128x128xf32>
    %cst_7 = arith.constant dense<0xFF800000> : vector<128xf32>
    %13 = vector.multi_reduction <maximumf>, %12, %cst_7 [1] : vector<128x128xf32> to vector<128xf32>
    %14 = vector.shape_cast %13 : vector<128xf32> to vector<128x1xf32>
    %15 = vector.broadcast %14 : vector<128x1xf32> to vector<128x128xf32>
    %16 = arith.subf %12, %15 : vector<128x128xf32>
    %17 = math.exp %16 : vector<128x128xf32>
    %cst_8 = arith.constant dense<0.000000e+00> : vector<128xf32>
    %18 = vector.multi_reduction <add>, %17, %cst_8 [1] : vector<128x128xf32> to vector<128xf32>
    %19 = vector.shape_cast %18 : vector<128xf32> to vector<128x1xf32>
    %20 = tpu.reciprocal %19 {approx = true} : vector<128x1xf32> -> vector<128x1xf32>
    %21 = vector.broadcast %20 : vector<128x1xf32> to vector<128x128xf32>
    %22 = arith.mulf %17, %21 : vector<128x128xf32>
    %cst_9 = arith.constant dense<0.000000e+00> : vector<128xf32>
    %23 = vector.multi_reduction <add>, %22, %cst_9 [0] : vector<128x128xf32> to vector<128xf32>
    %24 = vector.shape_cast %23 : vector<128xf32> to vector<1x128xf32>
    %cst_10 = arith.constant 9.99999971E-10 : f32
    %25 = vector.broadcast %cst_10 : f32 to vector<1x128xf32>
    %26 = arith.addf %25, %24 : vector<1x128xf32>
    %27 = tpu.reciprocal %26 {approx = true} : vector<1x128xf32> -> vector<1x128xf32>
    %28 = vector.broadcast %27 : vector<1x128xf32> to vector<128x128xf32>
    %29 = arith.mulf %22, %28 : vector<128x128xf32>
    %cst_11 = arith.constant dense<0.000000e+00> : vector<128x32xf32>
    %30 = tpu.matmul %29, %11, %cst_11 {dimension_numbers = #tpu.dot_dimension_numbers<[0], [0], [1], [1], [0, 1, 1, 1], [], []>} : vector<128x128xf32>, vector<128x32xf32>, vector<128x32xf32> -> vector<128x32xf32>
    %31 = arith.subf %1, %30 : vector<128x32xf32>
    %c0_12 = arith.constant 0 : index
    %c0_13 = arith.constant 0 : index
    %32 = vector.load %arg4[%c0_12, %c0_13] : memref<32x32xf32, #tpu.memory_space<vmem>>, vector<32x32xf32>
    %cst_14 = arith.constant dense<0.000000e+00> : vector<128x32xf32>
    %33 = tpu.matmul %31, %32, %cst_14 {dimension_numbers = #tpu.dot_dimension_numbers<[1], [0], [0], [1], [0, 0, 1, 1], [], []>} : vector<128x32xf32>, vector<32x32xf32>, vector<128x32xf32> -> vector<128x32xf32>
    %c0_15 = arith.constant 0 : index
    %c0_16 = arith.constant 0 : index
    %34 = vector.load %arg5[%c0_15, %c0_16] : memref<1x32xf32, #tpu.memory_space<vmem>>, vector<1x32xf32>
    %35 = vector.shape_cast %34 : vector<1x32xf32> to vector<32xf32>
    %36 = vector.shape_cast %35 : vector<32xf32> to vector<1x32xf32>
    %37 = vector.broadcast %36 : vector<1x32xf32> to vector<128x32xf32>
    %38 = arith.addf %33, %37 : vector<128x32xf32>
    %c0_17 = arith.constant 0 : index
    %c0_18 = arith.constant 0 : index
    %c0_19 = arith.constant 0 : index
    %39 = vector.load %arg6[%c0_17, %c0_18, %c0_19] : memref<1x128x128xf32, #tpu.memory_space<vmem>>, vector<1x128x128xf32>
    %40 = vector.shape_cast %39 : vector<1x128x128xf32> to vector<128x128xf32>
    %41 = vector.shape_cast %29 : vector<128x128xf32> to vector<1x128x128xf32>
    tpu.vector_store %arg6[%c0_17, %c0_18, %c0_19], %41 {strides = array<i32>} : memref<1x128x128xf32, #tpu.memory_space<vmem>>, vector<1x128x128xf32>,
    %c0_20 = arith.constant 0 : index
    %c0_21 = arith.constant 0 : index
    %c0_22 = arith.constant 0 : index
    %42 = vector.load %arg7[%c0_20, %c0_21, %c0_22] : memref<1x128x32xf32, #tpu.memory_space<vmem>>, vector<1x128x32xf32>
    %43 = vector.shape_cast %42 : vector<1x128x32xf32> to vector<128x32xf32>
    %44 = vector.shape_cast %38 : vector<128x32xf32> to vector<1x128x32xf32>
    tpu.vector_store %arg7[%c0_20, %c0_21, %c0_22], %44 {strides = array<i32>} : memref<1x128x32xf32, #tpu.memory_space<vmem>>, vector<1x128x32xf32>,
    %cst_23 = arith.constant dense<0.000000e+00> : vector<32xf32>
    %45 = vector.multi_reduction <add>, %38, %cst_23 [0] : vector<128x32xf32> to vector<32xf32>
    %46 = vector.shape_cast %45 : vector<32xf32> to vector<1x32xf32>
    %c0_24 = arith.constant 0 : index
    %c0_25 = arith.constant 0 : index
    %c0_26 = arith.constant 0 : index
    %47 = vector.load %arg8[%c0_24, %c0_25, %c0_26] : memref<1x1x32xf32, #tpu.memory_space<vmem>>, vector<1x1x32xf32>
    %48 = vector.shape_cast %47 : vector<1x1x32xf32> to vector<1x32xf32>
    %49 = vector.shape_cast %46 : vector<1x32xf32> to vector<1x1x32xf32>
    tpu.vector_store %arg8[%c0_24, %c0_25, %c0_26], %49 {strides = array<i32>} : memref<1x1x32xf32, #tpu.memory_space<vmem>>, vector<1x1x32xf32>,
    %50 = arith.mulf %38, %38 : vector<128x32xf32>
    %cst_27 = arith.constant dense<0.000000e+00> : vector<32xf32>
    %51 = vector.multi_reduction <add>, %50, %cst_27 [0] : vector<128x32xf32> to vector<32xf32>
    %52 = vector.shape_cast %51 : vector<32xf32> to vector<1x32xf32>
    %c0_28 = arith.constant 0 : index
    %c0_29 = arith.constant 0 : index
    %c0_30 = arith.constant 0 : index
    %53 = vector.load %arg9[%c0_28, %c0_29, %c0_30] : memref<1x1x32xf32, #tpu.memory_space<vmem>>, vector<1x1x32xf32>
    %54 = vector.shape_cast %53 : vector<1x1x32xf32> to vector<1x32xf32>
    %55 = vector.shape_cast %52 : vector<1x32xf32> to vector<1x1x32xf32>
    tpu.vector_store %arg9[%c0_28, %c0_29, %c0_30], %55 {strides = array<i32>} : memref<1x1x32xf32, #tpu.memory_space<vmem>>, vector<1x1x32xf32>,
    return
  }
  func.func @transform_0(%arg0: i32) -> (i32, i32, i32) {
    %c0_i32 = arith.constant 0 : i32
    %c0_i32_0 = arith.constant 0 : i32
    %c0_i32_1 = arith.constant 0 : i32
    return %arg0, %c0_i32, %c0_i32_0 : i32, i32, i32
  }
  func.func @transform_1(%arg0: i32) -> (i32, i32) {
    %c0_i32 = arith.constant 0 : i32
    %c0_i32_0 = arith.constant 0 : i32
    %c0_i32_1 = arith.constant 0 : i32
    return %c0_i32, %c0_i32_0 : i32, i32
  }
  func.func @transform_2(%arg0: i32) -> (i32, i32) {
    %c0_i32 = arith.constant 0 : i32
    %c0_i32_0 = arith.constant 0 : i32
    %c0_i32_1 = arith.constant 0 : i32
    return %c0_i32, %c0_i32_0 : i32, i32
  }
  func.func @transform_3(%arg0: i32) -> (i32, i32) {
    %c0_i32 = arith.constant 0 : i32
    %c0_i32_0 = arith.constant 0 : i32
    %c0_i32_1 = arith.constant 0 : i32
    return %c0_i32, %c0_i32_0 : i32, i32
  }
  func.func @transform_4(%arg0: i32) -> (i32, i32) {
    %c0_i32 = arith.constant 0 : i32
    %c0_i32_0 = arith.constant 0 : i32
    %c0_i32_1 = arith.constant 0 : i32
    return %c0_i32, %c0_i32_0 : i32, i32
  }
  func.func @transform_5(%arg0: i32) -> (i32, i32, i32) {
    %c0_i32 = arith.constant 0 : i32
    %c0_i32_0 = arith.constant 0 : i32
    %c0_i32_1 = arith.constant 0 : i32
    return %arg0, %c0_i32, %c0_i32_0 : i32, i32, i32
  }
  func.func @transform_6(%arg0: i32) -> (i32, i32, i32) {
    %c0_i32 = arith.constant 0 : i32
    %c0_i32_0 = arith.constant 0 : i32
    %c0_i32_1 = arith.constant 0 : i32
    return %arg0, %c0_i32, %c0_i32_0 : i32, i32, i32
  }
  func.func @transform_7(%arg0: i32) -> (i32, i32, i32) {
    %c0_i32 = arith.constant 0 : i32
    %c0_i32_0 = arith.constant 0 : i32
    %c0_i32_1 = arith.constant 0 : i32
    return %arg0, %c0_i32, %c0_i32_0 : i32, i32, i32
  }
  func.func @transform_8(%arg0: i32) -> (i32, i32, i32) {
    %c0_i32 = arith.constant 0 : i32
    %c0_i32_0 = arith.constant 0 : i32
    %c0_i32_1 = arith.constant 0 : i32
    return %arg0, %c0_i32, %c0_i32_0 : i32, i32, i32
  }
}

module attributes {stable_mosaic.version = 11 : i64} {
  func.func @pct_bn_kernel(%arg0: i32, %arg1: i32, %arg2: memref<1x32x128xf32, #tpu.memory_space<vmem>>, %arg3: memref<1x32x128xf32, #tpu.memory_space<vmem>>, %arg4: memref<1x128xf32, #tpu.memory_space<vmem>>, %arg5: memref<1x128xf32, #tpu.memory_space<vmem>>, %arg6: memref<1x32x128xf32, #tpu.memory_space<vmem>>) attributes {dimension_semantics = [#tpu.dimension_semantics<parallel>, #tpu.dimension_semantics<parallel>], iteration_bounds = array<i64: 2, 1>, scalar_prefetch = 0 : i64, scratch_operands = 0 : i64, tpu.core_type = #tpu.core_type<tc>, window_params = [{transform_indices = @transform_0, window_bounds = array<i64: 1, 32, 128>}, {transform_indices = @transform_1, window_bounds = array<i64: 1, 32, 128>}, {pipeline_mode = #tpu.pipeline_mode<synchronous>, transform_indices = @transform_2, window_bounds = array<i64: 1, 128>}, {pipeline_mode = #tpu.pipeline_mode<synchronous>, transform_indices = @transform_3, window_bounds = array<i64: 1, 128>}, {transform_indices = @transform_4, window_bounds = array<i64: 1, 32, 128>}]} {
    %c0 = arith.constant 0 : index
    %c0_0 = arith.constant 0 : index
    %c0_1 = arith.constant 0 : index
    %0 = vector.load %arg3[%c0, %c0_0, %c0_1] : memref<1x32x128xf32, #tpu.memory_space<vmem>>, vector<1x32x128xf32>
    %1 = vector.shape_cast %0 : vector<1x32x128xf32> to vector<32x128xf32>
    %c0_2 = arith.constant 0 : index
    %c0_3 = arith.constant 0 : index
    %2 = vector.load %arg4[%c0_2, %c0_3] : memref<1x128xf32, #tpu.memory_space<vmem>>, vector<1x128xf32>
    %3 = vector.broadcast %2 : vector<1x128xf32> to vector<32x128xf32>
    %4 = arith.mulf %1, %3 : vector<32x128xf32>
    %c0_4 = arith.constant 0 : index
    %c0_5 = arith.constant 0 : index
    %5 = vector.load %arg5[%c0_4, %c0_5] : memref<1x128xf32, #tpu.memory_space<vmem>>, vector<1x128xf32>
    %6 = vector.broadcast %5 : vector<1x128xf32> to vector<32x128xf32>
    %7 = arith.addf %4, %6 : vector<32x128xf32>
    %c0_6 = arith.constant 0 : index
    %c0_7 = arith.constant 0 : index
    %c0_8 = arith.constant 0 : index
    %8 = vector.load %arg2[%c0_6, %c0_7, %c0_8] : memref<1x32x128xf32, #tpu.memory_space<vmem>>, vector<1x32x128xf32>
    %9 = vector.shape_cast %8 : vector<1x32x128xf32> to vector<32x128xf32>
    %cst = arith.constant 0.000000e+00 : f32
    %10 = vector.broadcast %cst : f32 to vector<32x128xf32>
    %11 = arith.maximumf %7, %10 : vector<32x128xf32>
    %12 = arith.addf %9, %11 : vector<32x128xf32>
    %c0_9 = arith.constant 0 : index
    %c0_10 = arith.constant 0 : index
    %c0_11 = arith.constant 0 : index
    %13 = vector.load %arg6[%c0_9, %c0_10, %c0_11] : memref<1x32x128xf32, #tpu.memory_space<vmem>>, vector<1x32x128xf32>
    %14 = vector.shape_cast %13 : vector<1x32x128xf32> to vector<32x128xf32>
    %15 = vector.shape_cast %12 : vector<32x128xf32> to vector<1x32x128xf32>
    tpu.vector_store %arg6[%c0_9, %c0_10, %c0_11], %15 {strides = array<i32>} : memref<1x32x128xf32, #tpu.memory_space<vmem>>, vector<1x32x128xf32>,
    return
  }
  func.func @transform_0(%arg0: i32, %arg1: i32) -> (i32, i32, i32) {
    %c0_i32 = arith.constant 0 : i32
    %c0_i32_0 = arith.constant 0 : i32
    return %arg0, %arg1, %c0_i32 : i32, i32, i32
  }
  func.func @transform_1(%arg0: i32, %arg1: i32) -> (i32, i32, i32) {
    %c0_i32 = arith.constant 0 : i32
    %c0_i32_0 = arith.constant 0 : i32
    return %arg0, %arg1, %c0_i32 : i32, i32, i32
  }
  func.func @transform_2(%arg0: i32, %arg1: i32) -> (i32, i32) {
    %c0_i32 = arith.constant 0 : i32
    %c0_i32_0 = arith.constant 0 : i32
    %c0_i32_1 = arith.constant 0 : i32
    return %c0_i32, %c0_i32_0 : i32, i32
  }
  func.func @transform_3(%arg0: i32, %arg1: i32) -> (i32, i32) {
    %c0_i32 = arith.constant 0 : i32
    %c0_i32_0 = arith.constant 0 : i32
    %c0_i32_1 = arith.constant 0 : i32
    return %c0_i32, %c0_i32_0 : i32, i32
  }
  func.func @transform_4(%arg0: i32, %arg1: i32) -> (i32, i32, i32) {
    %c0_i32 = arith.constant 0 : i32
    %c0_i32_0 = arith.constant 0 : i32
    return %arg0, %arg1, %c0_i32 : i32, i32, i32
  }
}

</mosaic_0001>

<bundles_post_ra>
// kernel: pct_forward.3
= control target key start
LH: loop header
LB: loop body
LE: loop exit
PB: predicated region body
PF: predicated region fallthrough
CT: control target
= control target key end

     0   :  { %s511_s15 = smov 0   ;;  %s513_s16 = smov 0   ;;  %s553_s0 = inlined_call_operand.vmem [shape: f32[2,32,128], index: 0, kind: input, shape index: {}]   ;;  %s554_s1 = inlined_call_operand.vmem [shape: f32[2,32,128], index: 1, kind: input, shape index: {}]   ;;  %s555_s2 = inlined_call_operand.vmem [shape: f32[1,128], index: 2, kind: input, shape index: {}]   ;;  %s556_s3 = inlined_call_operand.vmem [shape: f32[1,128], index: 3, kind: input, shape index: {}]   ;;  %s557_s4 = inlined_call_operand.vmem [shape: f32[2,32,128], index: 4, kind: output, shape index: {}]  }
   0x1   :  { %s515_s17 = smov 0  }
   0x2 LB: > { %s26_s18 = sadd.s32 1, %s480_s16  ;;  %p424_p0 = scmp.ge.s32.totalorder %s484_s17, 1  ;;  %s484_s17 = sphi %s515_s17, %s14_s17   ;;  %s480_s16 = sphi %s513_s16, %s559_s16   ;;  %s476_s15 = sphi %s511_s15, %s558_s15  }
   0x3   : > { %p28_p1 = scmp.ge.s32.totalorder %s26_s18, 2  ;;  %p200_p2 = scmp.lt.s32.totalorder %s484_s17, 3 }
   0x5   : > { %s561_s18 = smov (%p28_p1, %s26_s18), 0  ;;  %p201_p3 = pnand %p424_p0, %p200_p2 }
   0x6   : > { %p244_p4 = scmp.lt.s32.totalorder (!%p201_p3), %s476_s15, 1  ;;  %v431_v0 = vld [vmem:[%s555_s2] ss:$0 sm:$0xff] (!%p201_p3) }
   0x7   : > { %204 = sbr.rel (%p201_p3) target bundleno = 28 (0x1c), region = 36  ;;  %v432_v2 = vld [vmem:[%s556_s3] ss:$0 sm:$0xff] (!%p201_p3) }
   0xe   : > { %s563_s15 = smov (!%p244_p4, %s476_s15), 1 }
   0xf   : > { %s435_s19 = sshll.u32 %s563_s15, 5 }
  0x10   : > { %s261_s24 = scalar_lea.vmem %s554_s1, %s435_s19  ;;  %s251_s29 = scalar_lea.vmem %s553_s0, %s435_s19 }
  0x11   : > { %v273_v1 = vld [vmem:[%s261_s24] sm:$0xff]  ;;  %v274_v3 = vld [vmem:[%s261_s24 + $0x8] sm:$0xff]  ;;  %v275_v6 = vld [vmem:[%s261_s24 + $0x10] sm:$0xff]  ;;  %s271_s6 = scalar_lea.vmem %s557_s4, %s435_s19 }
  0x12   : > { %v284_v4 = vmul.f32 %v431_v0, %v273_v1  ;;  %v285_v5 = vmul.f32 %v431_v0, %v274_v3  ;;  %v286_v7 = vmul.f32 %v431_v0, %v275_v6  ;;  %v276_v8 = vld [vmem:[%s261_s24 + $0x18] sm:$0xff]  ;;  %v299_v12 = vld [vmem:[%s251_s29] sm:$0xff]  ;;  %v300_v13 = vld [vmem:[%s251_s29 + $0x8] sm:$0xff] }
  0x13   : > { %v287_v11 = vmul.f32 %v431_v0, %v276_v8  ;;  %v301_v17 = vld [vmem:[%s251_s29 + $0x10] sm:$0xff]  ;;  %v302_v20 = vld [vmem:[%s251_s29 + $0x18] sm:$0xff] }
  0x14   : > { %v295_v9 = vadd.f32 %v432_v2, %v284_v4  ;;  %v296_v10 = vadd.f32 %v432_v2, %v285_v5  ;;  %v297_v14 = vadd.f32 %v432_v2, %v286_v7 }
  0x15   : > { %v298_v18 = vadd.f32 %v432_v2, %v287_v11 }
  0x16   : > { %v303_v15 = vmax.f32 %v295_v9, 0.0  ;;  %v304_v16 = vmax.f32 %v296_v10, 0.0  ;;  %v305_v19 = vmax.f32 %v297_v14, 0.0 }
  0x17   : > { %v306_v23 = vmax.f32 %v298_v18, 0.0 }
  0x18   : > { %v307_v21 = vadd.f32 %v303_v15, %v299_v12  ;;  %v308_v22 = vadd.f32 %v304_v16, %v300_v13  ;;  %v309_v24 = vadd.f32 %v305_v19, %v301_v17 }
  0x19   : > { %v310_v25 = vadd.f32 %v306_v23, %v302_v20 }
  0x1a   : > { %311 = vst [vmem:[%s271_s6] sm:$0xff] %v307_v21  ;;  %312 = vst [vmem:[%s271_s6 + $0x8] sm:$0xff] %v308_v22 }
  0x1b   : > { %313 = vst [vmem:[%s271_s6 + $0x10] sm:$0xff] %v309_v24  ;;  %314 = vst [vmem:[%s271_s6 + $0x18] sm:$0xff] %v310_v25 }
  0x1c PF: > { %s14_s17 = sadd.s32 1, %s484_s17   ;;  %s558_s15 = smov %s480_s16 }
  0x1d   : > { %p11_p5 = scmp.ge.s32.totalorder %s14_s17, 4   ;;  %s559_s16 = smov %s561_s18 }
  0x1f   :  { %13 = sbr.rel (!%p11_p5) target bundleno = 2 (0x2), region = 69 }

// kernel: pct_forward.2
= control target key start
LH: loop header
LB: loop body
LE: loop exit
PB: predicated region body
PF: predicated region fallthrough
CT: control target
= control target key end

     0   :  { %14 = vsyncpa [#allocation3], 0  ;;  %s3145_s0 = inlined_call_operand.vmem [shape: f32[2,128,32], index: 0, kind: input, shape index: {}]   ;;  %s3146_s1 = inlined_call_operand.vmem [shape: f32[32,48], index: 1, kind: input, shape index: {}]   ;;  %s3147_s2 = inlined_call_operand.vmem [shape: f32[1,32], index: 2, kind: input, shape index: {}]   ;;  %s3148_s3 = inlined_call_operand.vmem [shape: f32[32,32], index: 3, kind: input, shape index: {}]   ;;  %s3149_s4 = inlined_call_operand.vmem [shape: f32[1,32], index: 4, kind: input, shape index: {}]   ;;  %s3150_s5 = inlined_call_operand.hbm [shape: f32[2,128,128], index: 5, kind: output, shape index: {0}]   ;;  %s3151_s6 = inlined_call_operand.vmem [shape: f32[2,128,32], index: 6, kind: output, shape index: {1}]   ;;  %s3152_s7 = inlined_call_operand.vmem [shape: f32[2,1,32], index: 7, kind: output, shape index: {2}]   ;;  %s3153_s8 = inlined_call_operand.vmem [shape: f32[2,1,32], index: 8, kind: output, shape index: {3}]  }
   0x1   :  { %16 = vsyncpa [#allocation3 + $0x1], 0  ;;  %s2554_s27 = smov 0   ;;  %s2556_s28 = smov 0  }
   0x2   :  { %s2558_s29 = smov 0   ;;  %s2560_s30 = smov 0  }
   0x3 LB: > { %s2575_s9 = sadd.s32 4294967295, %s2501_s30   ;;  %s1758_s10 = sadd.s32 4294967294, %s2501_s30   ;;  %s2501_s30 = sphi %s2560_s30, %s3161_s30   ;;  %s2497_s29 = sphi %s2558_s29, %s3160_s29   ;;  %s2493_s28 = sphi %s2556_s28, %s3159_s28   ;;  %s2489_s27 = sphi %s2554_s27, %s3158_s27  }
   0x4   : > { %s2579_s11 = sadd.s32 1, %s2501_s30   ;;  %s139_s12 = sadd.s32 1, %s2497_s29 }
   0x5   : > { %s136_s13 = ssub.s32 %s2501_s30, %s2579_s11  ;;  %p149_p0 = scmp.ne.s32.totalorder %s2497_s29, %s2493_s28 }
   0x6   : > { %p137_p1 = scmp.eq.s32.totalorder %s136_s13, 0  ;;  %p150_p2 = scmp.eq.s32.totalorder %s2575_s9, 1 }
   0x7   : > { %p155_p3 = scmp.ne.s32.totalorder %s2493_s28, %s2489_s27  ;;  %p156_p4 = scmp.eq.s32.totalorder %s1758_s10, 1 }
   0x8   : > { %s2590_s14 = scalar_select %p137_p1, %s2497_s29, %s139_s12  }
   0x9   : > { %p2592_p5 = por %p150_p2, %p149_p0  ;;  %p2596_p6 = por %p156_p4, %p155_p3 }
   0xa   : > { %p1761_p7 = scmp.ge.s32.totalorder %s2501_s30, 1  ;;  %p272_p8 = scmp.lt.s32.totalorder %s2501_s30, 3 }
   0xc   : > { %p273_p9 = pnand %p1761_p7, %p272_p8 }
   0xd   : > { %v349_v0 = vld [vmem:[%s3146_s1] sm:$0xff] (!%p273_p9)  ;;  %v350_v1 = vld [vmem:[%s3146_s1 + $0x8] sm:$0xff] (!%p273_p9)  ;;  %v351_v2 = vld [vmem:[%s3146_s1 + $0x10] sm:$0xff] (!%p273_p9)  ;;  %p317_p10 = scmp.lt.s32.totalorder (!%p273_p9), %s2575_s9, 1  ;;  %vm353_vm0 = vcmask (!%p273_p9), 261120   ;;  %vm620_vm1 = vcmask (!%p273_p9), 64512  }
   0xe   : > { %276 = sbr.rel (%p273_p9) target bundleno = 1699 (0x6a3), region = 40  ;;  %v2121_v3 = vpack.c.bf16 (!%p273_p9), %v350_v1, %v349_v0  ;;  %v352_v4 = vld [vmem:[%s3146_s1 + $0x18] sm:$0xff] (!%p273_p9)  ;;  %s2503_s17 = smov (!%p273_p9), 120   ;;  %vm2710_vm2 = vmpackc.low (!%p273_p9), %vm620_vm1, %vm620_vm1 }
   0xf   : > { %v2125_v5 = vpack.c.bf16 (!%p273_p9), %v352_v4, %v351_v2  ;;  %s2504_s20 = smov (!%p273_p9), 16   ;;  %s2505_s21 = smov (!%p273_p9), 112  }
  0x10   : > { %2122 = vmatprep.subr.bf16.mxu0 (!%p273_p9), %v2121_v3  ;;  %s297_s22 = sand.u32 (!%p273_p9), 1, %s2493_s28   ;;  %s1840_s10 = sshll.u32 (!%p273_p9), %s2575_s9, 11 }
  0x11   : > { %2124 = vmatpush3.bf16.msra.mxu0 (!%p273_p9), %v2121_v3  ;;  %s1762_s23 = sshll.u32 (!%p273_p9), %s297_s22, 7  ;;  %s2998_s19 = scalar_lea.hbm (!%p273_p9), %s3150_s5, %s1840_s10 }
  0x12   : > { %2126 = vmatprep.subr.bf16.mxu0 (!%p273_p9), %v2125_v5  ;;  %s2911_s24 = scalar_lea.vmem (!%p273_p9), [#allocation2], %s1762_s23 }
  0x13   : > { %s1624_s12 = sshll.u32 (!%p273_p9), %s2911_s24, 4  ;;  %s3000_s12 = int_to_ptr.vmem [resolvable:$true] %s1624_s12 }
  0x15   : > { %s2616_s25 = scalar_select %p317_p10, %s2575_s9, 1  ;;  %2128 = vmatpush3.bf16.msra.mxu0 %v2125_v5 }
  0x16   : > { %s2506_s9 = smov [#allocation2]  }
  0x17   : > { %s1838_s26 = sshll.u32 %s2616_s25, 7 }
  0x18   : > { %s2624_s13 = scalar_lea.vmem %s3145_s0, %s1838_s26 }
  0x19   : > { %v333_v6 = vld [vmem:[%s2624_s13] sm:$0xff]  ;;  %v334_v7 = vld [vmem:[%s2624_s13 + $0x8] sm:$0xff]  ;;  %v335_v8 = vld [vmem:[%s2624_s13 + $0x10] sm:$0xff] }
  0x1a   : > { %1953 = vmatprep.mubr.msk.f32.mxu0 %vm353_vm0, %v333_v6  ;;  %v336_v9 = vld [vmem:[%s2624_s13 + $0x18] sm:$0xff]  ;;  %v337_v10 = vld [vmem:[%s2624_s13 + $0x20] sm:$0xff]  ;;  %v338_v11 = vld [vmem:[%s2624_s13 + $0x28] sm:$0xff] }
  0x1b   : > { %1954 = vmatmul.mubr.msk.f32.vlgmr.msra.gmra.mrb[0].mxu0 %vm353_vm0, %v334_v7  ;;  %v339_v12 = vld [vmem:[%s2624_s13 + $0x30] sm:$0xff]  ;;  %v340_v13 = vld [vmem:[%s2624_s13 + $0x38] sm:$0xff]  ;;  %v341_v14 = vld [vmem:[%s2624_s13 + $0x40] sm:$0xff] }
  0x1c   : > { %1956 = vmatprep.mubr.msk.f32.mxu0 %vm353_vm0, %v335_v8  ;;  %v342_v15 = vld [vmem:[%s2624_s13 + $0x48] sm:$0xff]  ;;  %v343_v16 = vld [vmem:[%s2624_s13 + $0x50] sm:$0xff]  ;;  %v344_v17 = vld [vmem:[%s2624_s13 + $0x58] sm:$0xff] }
  0x1d   : > { %v345_v18 = vld [vmem:[%s2624_s13 + $0x60] sm:$0xff]  ;;  %v346_v19 = vld [vmem:[%s2624_s13 + $0x68] sm:$0xff]  ;;  %v347_v20 = vld [vmem:[%s2624_s13 + $0x70] sm:$0xff] }
  0x1e   : > { %v348_v21 = vld [vmem:[%s2624_s13 + $0x78] sm:$0xff] }
  0x1f   : > { %1957 = vmatmul.mubr.msk.f32.gmra.mrb[2].mxu0 %vm353_vm0, %v336_v9 }
  0x20   : > { %1959 = vmatprep.mubr.msk.f32.mxu0 %vm353_vm0, %v337_v10 }
  0x23   : > { %1960 = vmatmul.mubr.msk.f32.gmra.mrb[4].mxu0 %vm353_vm0, %v338_v11 }
  0x24   : > { %1962 = vmatprep.mubr.msk.f32.mxu0 %vm353_vm0, %v339_v12 }
  0x27   : > { %1963 = vmatmul.mubr.msk.f32.gmra.mrb[6].mxu0 %vm353_vm0, %v340_v13 }
  0x28   : > { %1965 = vmatprep.mubr.msk.f32.mxu0 %vm353_vm0, %v341_v14 }
  0x2b   : > { %1966 = vmatmul.mubr.msk.f32.gmra.mrb[8].mxu0 %vm353_vm0, %v342_v15 }
  0x2c   : > { %1968 = vmatprep.mubr.msk.f32.mxu0 %vm353_vm0, %v343_v16 }
  0x2f   : > { %1969 = vmatmul.mubr.msk.f32.gmra.mrb[10].mxu0 %vm353_vm0, %v344_v17 }
  0x30   : > { %1971 = vmatprep.mubr.msk.f32.mxu0 %vm353_vm0, %v345_v18 }
  0x33   : > { %1972 = vmatmul.mubr.msk.f32.gmra.mrb[12].mxu0 %vm353_vm0, %v346_v19 }
  0x34   : > { %1974 = vmatprep.mubr.msk.f32.mxu0 %vm353_vm0, %v347_v20 }
  0x37   : > { %1975 = vmatmul.mubr.msk.f32.gmra.mrb[14].mxu0 %vm353_vm0, %v348_v21 }
  0xee   : > { %v2658_v22 = vpop.f32.mrb[0].mxu0 }
  0xef   : > { %v2660_v23 = vpop.f32.mrb[1].mxu0 }
  0xf0   : > { %2009 = vmatprep.mubr.msk.f32.mxu1 %vm620_vm1, %v2660_v23  ;;  %v2277_v24 = vpack.i.bf16 %v2658_v22, %v2660_v23 }
  0xf2   : > { %2278 = vrot.lane.b32.xlu0 %v2277_v24, %s2503_s17  ;;  %v2666_v25 = vpop.f32.mrb[2].mxu0 }
  0xf3   : > { %v2668_v26 = vpop.f32.mrb[3].mxu0 }
  0xf4   : > { %v2282_v27 = vpack.i.bf16 %v2666_v25, %v2668_v26 }
  0xf6   : > { %2283 = vrot.lane.b32.xlu0 %v2282_v27, %s2503_s17  ;;  %v2672_v28 = vpop.f32.mrb[4].mxu0 }
  0xf7   : > { %v2674_v29 = vpop.f32.mrb[5].mxu0 }
  0xf8   : > { %v2287_v30 = vpack.i.bf16 %v2672_v28, %v2674_v29 }
  0xfa   : > { %2288 = vrot.lane.b32.xlu1 %v2287_v30, %s2503_s17  ;;  %v2678_v31 = vpop.f32.mrb[6].mxu0 }
  0xfb   : > { %v2680_v32 = vpop.f32.mrb[7].mxu0 }
  0xfc   : > { %v2292_v33 = vpack.i.bf16 %v2678_v31, %v2680_v32 }
  0xfe   : > { %2293 = vrot.lane.b32.xlu1 %v2292_v33, %s2503_s17  ;;  %v2684_v34 = vpop.f32.mrb[8].mxu0 }
  0xff   : > { %v2686_v35 = vpop.f32.mrb[9].mxu0 }
 0x100   : > { %v2297_v36 = vpack.i.bf16 %v2684_v34, %v2686_v35 }
 0x102   : > { %2298 = vrot.lane.b32.xlu0 %v2297_v36, %s2503_s17  ;;  %v2690_v37 = vpop.f32.mrb[10].mxu0 }
 0x103   : > { %v2692_v38 = vpop.f32.mrb[11].mxu0 }
 0x104   : > { %v2302_v39 = vpack.i.bf16 %v2690_v37, %v2692_v38 }
 0x106   : > { %2303 = vrot.lane.b32.xlu1 %v2302_v39, %s2503_s17  ;;  %v2696_v40 = vpop.f32.mrb[12].mxu0 }
 0x107   : > { %v2698_v41 = vpop.f32.mrb[13].mxu0 }
 0x108   : > { %v2307_v42 = vpack.i.bf16 %v2696_v40, %v2698_v41 }
 0x10a   : > { %2308 = vrot.lane.b32.xlu0 %v2307_v42, %s2503_s17  ;;  %v2702_v43 = vpop.f32.mrb[14].mxu0 }
 0x10b   : > { %v2704_v44 = vpop.f32.mrb[15].mxu0 }
 0x10c   : > { %v2312_v45 = vpack.i.bf16 %v2702_v43, %v2704_v44 }
 0x10e   : > { %2313 = vrot.lane.b32.xlu1 %v2312_v45, %s2503_s17 }
 0x164   : > { %v2279_v46 = vpop.permute.xlu0 %2278 }
 0x165   : > { %v2281_v47 = vunpack.i.h.bf16 %v2279_v46  ;;  %v2280_v48 = vunpack.i.l.bf16 %v2279_v46 }
 0x167   : > { %v2129_v50 = vpack.c.bf16 %v2281_v47, %v2280_v48 }
 0x168   : > { %v2284_v51 = vpop.permute.xlu0 %2283 }
 0x169   : > { %2131 = vmatprep.subr.msk.bf16.mxu1 %vm2710_vm2, %v2129_v50  ;;  %v2286_v52 = vunpack.i.h.bf16 %v2284_v51  ;;  %v2285_v53 = vunpack.i.l.bf16 %v2284_v51 }
 0x16a   : > { %2134 = vmatpush3.bf16.xpose.msk.msra.mxu1 %vm2710_vm2, %v2129_v50 }
 0x16b   : > { %v2135_v54 = vpack.c.bf16 %v2286_v52, %v2285_v53 }
 0x16c   : > { %v2289_v55 = vpop.permute.xlu1 %2288 }
 0x16d   : > { %2137 = vmatprep.subr.msk.bf16.mxu1 %vm2710_vm2, %v2135_v54  ;;  %v2291_v56 = vunpack.i.h.bf16 %v2289_v55  ;;  %v2290_v57 = vunpack.i.l.bf16 %v2289_v55 }
 0x16f   : > { %v2141_v58 = vpack.c.bf16 %v2291_v56, %v2290_v57 }
 0x170   : > { %v2294_v59 = vpop.permute.xlu1 %2293 }
 0x171   : > { %v2296_v60 = vunpack.i.h.bf16 %v2294_v59  ;;  %v2295_v61 = vunpack.i.l.bf16 %v2294_v59 }
 0x172   : > { %2140 = vmatpush3.bf16.xpose.msk.msra.mxu1 %vm2710_vm2, %v2135_v54 }
 0x173   : > { %2143 = vmatprep.subr.msk.bf16.mxu1 %vm2710_vm2, %v2141_v58  ;;  %v2147_v62 = vpack.c.bf16 %v2296_v60, %v2295_v61 }
 0x174   : > { %v2299_v63 = vpop.permute.xlu0 %2298 }
 0x175   : > { %v2301_v0 = vunpack.i.h.bf16 %v2299_v63  ;;  %v2300_v1 = vunpack.i.l.bf16 %v2299_v63 }
 0x177   : > { %v2153_v2 = vpack.c.bf16 %v2301_v0, %v2300_v1 }
 0x178   : > { %v2304_v3 = vpop.permute.xlu1 %2303 }
 0x179   : > { %v2306_v4 = vunpack.i.h.bf16 %v2304_v3  ;;  %v2305_v5 = vunpack.i.l.bf16 %v2304_v3 }
 0x17a   : > { %2146 = vmatpush3.bf16.xpose.msk.msra.mxu1 %vm2710_vm2, %v2141_v58 }
 0x17b   : > { %2149 = vmatprep.subr.msk.bf16.mxu1 %vm2710_vm2, %v2147_v62  ;;  %v2159_v6 = vpack.c.bf16 %v2306_v4, %v2305_v5 }
 0x17c   : > { %v2309_v7 = vpop.permute.xlu0 %2308 }
 0x17d   : > { %v2311_v8 = vunpack.i.h.bf16 %v2309_v7  ;;  %v2310_v9 = vunpack.i.l.bf16 %v2309_v7 }
 0x17f   : > { %v2165_v10 = vpack.c.bf16 %v2311_v8, %v2310_v9 }
 0x180   : > { %v2314_v11 = vpop.permute.xlu1 %2313 }
 0x181   : > { %v2316_v12 = vunpack.i.h.bf16 %v2314_v11  ;;  %v2315_v13 = vunpack.i.l.bf16 %v2314_v11 }
 0x182   : > { %2152 = vmatpush3.bf16.xpose.msk.msra.mxu1 %vm2710_vm2, %v2147_v62 }
 0x183   : > { %2155 = vmatprep.subr.msk.bf16.mxu1 %vm2710_vm2, %v2153_v2  ;;  %v2171_v14 = vpack.c.bf16 %v2316_v12, %v2315_v13 }
 0x18a   : > { %2158 = vmatpush3.bf16.xpose.msk.msra.mxu1 %vm2710_vm2, %v2153_v2 }
 0x18b   : > { %2161 = vmatprep.subr.msk.bf16.mxu1 %vm2710_vm2, %v2159_v6 }
 0x192   : > { %2164 = vmatpush3.bf16.xpose.msk.msra.mxu1 %vm2710_vm2, %v2159_v6 }
 0x193   : > { %2167 = vmatprep.subr.msk.bf16.mxu1 %vm2710_vm2, %v2165_v10 }
 0x19a   : > { %2170 = vmatpush3.bf16.xpose.msk.msra.mxu1 %vm2710_vm2, %v2165_v10 }
 0x19b   : > { %2173 = vmatprep.subr.msk.bf16.mxu1 %vm2710_vm2, %v2171_v14 }
 0x1a2   : > { %2176 = vmatpush3.bf16.xpose.msk.msra.mxu1 %vm2710_vm2, %v2171_v14 }
 0x1a9   : > { %2010 = vmatmul.mubr.msk.f32.vlgmr.msra.gmra.mrb[0].mxu1 %vm620_vm1, %v2658_v22 }
 0x1aa   : > { %2012 = vmatprep.mubr.msk.f32.mxu1 %vm620_vm1, %v2668_v26 }
 0x1ad   : > { %2013 = vmatmul.mubr.msk.f32.gmra.mrb[2].mxu1 %vm620_vm1, %v2666_v25 }
 0x1ae   : > { %2015 = vmatprep.mubr.msk.f32.mxu1 %vm620_vm1, %v2674_v29 }
 0x1b1   : > { %2016 = vmatmul.mubr.msk.f32.gmra.mrb[4].mxu1 %vm620_vm1, %v2672_v28 }
 0x1b2   : > { %2018 = vmatprep.mubr.msk.f32.mxu1 %vm620_vm1, %v2680_v32 }
 0x1b5   : > { %2019 = vmatmul.mubr.msk.f32.gmra.mrb[6].mxu1 %vm620_vm1, %v2678_v31 }
 0x1b6   : > { %2021 = vmatprep.mubr.msk.f32.mxu1 %vm620_vm1, %v2686_v35 }
 0x1b9   : > { %2022 = vmatmul.mubr.msk.f32.gmra.mrb[8].mxu1 %vm620_vm1, %v2684_v34 }
 0x1ba   : > { %2024 = vmatprep.mubr.msk.f32.mxu1 %vm620_vm1, %v2692_v38 }
 0x1bd   : > { %2025 = vmatmul.mubr.msk.f32.gmra.mrb[10].mxu1 %vm620_vm1, %v2690_v37 }
 0x1be   : > { %2027 = vmatprep.mubr.msk.f32.mxu1 %vm620_vm1, %v2698_v41 }
 0x1c1   : > { %2028 = vmatmul.mubr.msk.f32.gmra.mrb[12].mxu1 %vm620_vm1, %v2696_v40 }
 0x1c2   : > { %2030 = vmatprep.mubr.msk.f32.mxu1 %vm620_vm1, %v2704_v44 }
 0x1c5   : > { %2031 = vmatmul.mubr.msk.f32.gmra.mrb[14].mxu1 %vm620_vm1, %v2702_v43 }
 0x27c   : > { %v2011_v15 = vpop.f32.mrb[0].mxu1 }
 0x27d   : > { %832 = vmax.xlane.f32.xlu1 %v2011_v15  ;;  %v751_v16 = vpop.f32.mrb[1].mxu1 }
 0x27e   : > { %830 = vmax.xlane.f32.xlu0 %v751_v16 }
 0x280   : > { %v2014_v17 = vpop.f32.mrb[2].mxu1 }
 0x281   : > { %v761_v18 = vpop.f32.mrb[3].mxu1 }
 0x282   : > { %834 = vmax.xlane.f32.xlu0 %v761_v18 }
 0x284   : > { %v2017_v19 = vpop.f32.mrb[4].mxu1 }
 0x285   : > { %v771_v20 = vpop.f32.mrb[5].mxu1 }
 0x286   : > { %836 = vmax.xlane.f32.xlu0 %v2014_v17  ;;  %838 = vmax.xlane.f32.xlu1 %v771_v20 }
 0x288   : > { %v2020_v21 = vpop.f32.mrb[6].mxu1 }
 0x289   : > { %v781_v24 = vpop.f32.mrb[7].mxu1 }
 0x28a   : > { %840 = vmax.xlane.f32.xlu0 %v2017_v19  ;;  %842 = vmax.xlane.f32.xlu1 %v781_v24 }
 0x28c   : > { %v2776_v27 = vpop.f32.mrb[8].mxu1 }
 0x28d   : > { %v791_v30 = vpop.f32.mrb[9].mxu1 }
 0x28e   : > { %844 = vmax.xlane.f32.xlu0 %v2020_v21  ;;  %846 = vmax.xlane.f32.xlu1 %v791_v30 }
 0x290   : > { %v2778_v33 = vpop.f32.mrb[10].mxu1 }
 0x291   : > { %v801_v36 = vpop.f32.mrb[11].mxu1 }
 0x292   : > { %848 = vmax.xlane.f32.xlu0 %v2776_v27  ;;  %850 = vmax.xlane.f32.xlu1 %v801_v36 }
 0x294   : > { %v2781_v39 = vpop.f32.mrb[12].mxu1 }
 0x295   : > { %v2783_v42 = vpop.f32.mrb[13].mxu1 }
 0x296   : > { %852 = vmax.xlane.f32.xlu0 %v2778_v33  ;;  %854 = vmax.xlane.f32.xlu1 %v2783_v42 }
 0x298   : > { %v2787_v45 = vpop.f32.mrb[14].mxu1 }
 0x299   : > { %v2789_v46 = vpop.f32.mrb[15].mxu1 }
 0x29a   : > { %856 = vmax.xlane.f32.xlu0 %v2781_v39  ;;  %858 = vmax.xlane.f32.xlu1 %v2789_v46 }
 0x29e   : > { %860 = vmax.xlane.f32.xlu0 %v2787_v45 }
 0x30a   : > { %v833_v47 = vpop.xlane.xlu1 %832 }
 0x30b   : > { %v863_v48 = vsub.f32 %v2011_v15, %v833_v47  ;;  %v831_v49 = vpop.xlane.xlu0 %830 }
 0x30c   : > { %v862_v50 = vsub.f32 %v751_v16, %v831_v49 }
 0x30d   : > { %v880_v51 = vmul.f32 1.442695, %v863_v48 }
 0x30e   : > { %v878_v52 = vmul.f32 1.442695, %v862_v50 }
 0x30f   : > { %2357 = vpow2.f32 %v880_v51  ;;  %v835_v53 = vpop.xlane.xlu0 %834 }
 0x310   : > { %2359 = vpow2.f32 %v878_v52  ;;  %v864_v54 = vsub.f32 %v761_v18, %v835_v53 }
 0x312   : > { %v882_v55 = vmul.f32 1.442695, %v864_v54 }
 0x313   : > { %v837_v56 = vpop.xlane.xlu0 %836  ;;  %v839_v57 = vpop.xlane.xlu1 %838 }
 0x314   : > { %2361 = vpow2.f32 %v882_v55  ;;  %v865_v58 = vsub.f32 %v2014_v17, %v837_v56  ;;  %v866_v59 = vsub.f32 %v771_v20, %v839_v57 }
 0x316   : > { %v884_v60 = vmul.f32 1.442695, %v865_v58  ;;  %v886_v61 = vmul.f32 1.442695, %v866_v59 }
 0x317   : > { %v841_v62 = vpop.xlane.xlu0 %840  ;;  %v843_v63 = vpop.xlane.xlu1 %842 }
 0x318   : > { %2363 = vpow2.f32 %v884_v60  ;;  %v867_v0 = vsub.f32 %v2017_v19, %v841_v62  ;;  %v868_v1 = vsub.f32 %v781_v24, %v843_v63  ;;  %v1783_v60 = vld [vmem:[%s3147_s2] ss:$0 sm:$0xff] }
 0x319   : > { %v2794_v2 = vpop.eup %2357  ;;  %2365 = vpow2.f32 %v886_v61 }
 0x31a   : > { %v2796_v3 = vpop.eup %2359  ;;  %v888_v4 = vmul.f32 1.442695, %v867_v0  ;;  %v890_v5 = vmul.f32 1.442695, %v868_v1  ;;  %912 = vadd.xlane.f32.xlu0 %v2794_v2 }
 0x31b   : > { %v845_v6 = vpop.xlane.xlu0 %844  ;;  %v847_v7 = vpop.xlane.xlu1 %846  ;;  %910 = vadd.xlane.f32.xlu1 %v2796_v3 }
 0x31c   : > { %2367 = vpow2.f32 %v888_v4  ;;  %v869_v8 = vsub.f32 %v2020_v21, %v845_v6  ;;  %v870_v9 = vsub.f32 %v791_v30, %v847_v7 }
 0x31d   : > { %2369 = vpow2.f32 %v890_v5 }
 0x31e   : > { %v2800_v10 = vpop.eup %2361  ;;  %v892_v11 = vmul.f32 1.442695, %v869_v8  ;;  %v894_v12 = vmul.f32 1.442695, %v870_v9 }
 0x31f   : > { %v849_v13 = vpop.xlane.xlu0 %848  ;;  %v851_v14 = vpop.xlane.xlu1 %850  ;;  %914 = vadd.xlane.f32.xlu1 %v2800_v10 }
 0x320   : > { %2371 = vpow2.f32 %v892_v11  ;;  %v871_v15 = vsub.f32 %v2776_v27, %v849_v13  ;;  %v872_v16 = vsub.f32 %v801_v36, %v851_v14 }
 0x321   : > { %2373 = vpow2.f32 %v894_v12 }
 0x322   : > { %v2804_v17 = vpop.eup %2363  ;;  %v896_v18 = vmul.f32 1.442695, %v871_v15  ;;  %v898_v19 = vmul.f32 1.442695, %v872_v16 }
 0x323   : > { %v2806_v20 = vpop.eup %2365  ;;  %v853_v21 = vpop.xlane.xlu0 %852  ;;  %916 = vadd.xlane.f32.xlu0 %v2804_v17 }
 0x324   : > { %v855_v24 = vpop.xlane.xlu1 %854  ;;  %2375 = vpow2.f32 %v896_v18  ;;  %v873_v30 = vsub.f32 %v2778_v33, %v853_v21  ;;  %918 = vadd.xlane.f32.xlu1 %v2806_v20 }
 0x325   : > { %v874_v47 = vsub.f32 %v2783_v42, %v855_v24  ;;  %2377 = vpow2.f32 %v898_v19 }
 0x326   : > { %v2812_v27 = vpop.eup %2367  ;;  %v900_v36 = vmul.f32 1.442695, %v873_v30 }
 0x327   : > { %v902_v48 = vmul.f32 1.442695, %v874_v47  ;;  %v2814_v49 = vpop.eup %2369  ;;  %v857_v50 = vpop.xlane.xlu0 %856  ;;  %920 = vadd.xlane.f32.xlu0 %v2812_v27 }
 0x328   : > { %2379 = vpow2.f32 %v900_v36  ;;  %v875_v51 = vsub.f32 %v2781_v39, %v857_v50  ;;  %922 = vadd.xlane.f32.xlu1 %v2814_v49  ;;  %v859_v61 = vpop.xlane.xlu1 %858 }
 0x329   : > { %2381 = vpow2.f32 %v902_v48  ;;  %v876_v62 = vsub.f32 %v2789_v46, %v859_v61 }
 0x32a   : > { %v2819_v33 = vpop.eup %2371  ;;  %v904_v42 = vmul.f32 1.442695, %v875_v51 }
 0x32b   : > { %v2821_v52 = vpop.eup %2373  ;;  %924 = vadd.xlane.f32.xlu0 %v2819_v33  ;;  %v861_v53 = vpop.xlane.xlu0 %860  ;;  %v906_v63 = vmul.f32 1.442695, %v876_v62 }
 0x32c   : > { %2383 = vpow2.f32 %v904_v42  ;;  %v877_v54 = vsub.f32 %v2787_v45, %v861_v53  ;;  %926 = vadd.xlane.f32.xlu1 %v2821_v52 }
 0x32e   : > { %v2826_v55 = vpop.eup %2375  ;;  %v908_v56 = vmul.f32 1.442695, %v877_v54 }
 0x32f   : > { %v2828_v39 = vpop.eup %2377  ;;  %928 = vadd.xlane.f32.xlu0 %v2826_v55 }
 0x330   : > { %2385 = vpow2.f32 %v908_v56  ;;  %930 = vadd.xlane.f32.xlu1 %v2828_v39 }
 0x331   : > { %2387 = vpow2.f32 %v906_v63 }
 0x332   : > { %v2832_v57 = vpop.eup %2379 }
 0x333   : > { %v2834_v58 = vpop.eup %2381  ;;  %932 = vadd.xlane.f32.xlu0 %v2832_v57 }
 0x334   : > { %934 = vadd.xlane.f32.xlu1 %v2834_v58 }
 0x336   : > { %v2838_v45 = vpop.eup %2383 }
 0x337   : > { %936 = vadd.xlane.f32.xlu0 %v2838_v45 }
 0x33a   : > { %v2841_v59 = vpop.eup %2385 }
 0x33b   : > { %940 = vadd.xlane.f32.xlu0 %v2841_v59  ;;  %v2848_v0 = vpop.eup %2387 }
 0x345   : > { %553 = vrot.lane.b32.xlu1 %v1783_v60, %s2504_s20  ;;  %s3004_s20 = scalar_lea.sflag [#allocation3], %s297_s22 }
 0x369   : > { %938 = vadd.xlane.f32.xlu1 %v2848_v0 }
 0x3a7   : > { %v913_v9 = vpop.xlane.xlu0 %912 }
 0x3a8   : > { %v911_v1 = vpop.xlane.xlu1 %910  ;;  %2389 = vrcp.f32 %v913_v9 }
 0x3a9   : > { %2391 = vrcp.f32 %v911_v1 }
 0x3ac   : > { %v915_v4 = vpop.xlane.xlu1 %914 }
 0x3ad   : > { %2393 = vrcp.f32 %v915_v4 }
 0x3b0   : > { %v917_v12 = vpop.xlane.xlu0 %916 }
 0x3b1   : > { %v919_v5 = vpop.xlane.xlu1 %918  ;;  %2395 = vrcp.f32 %v917_v12 }
 0x3b2   : > { %v2390_v51 = vpop.eup %2389  ;;  %2397 = vrcp.f32 %v919_v5 }
 0x3b3   : > { %v2392_v54 = vpop.eup %2391 }
 0x3b4   : > { %v921_v56 = vpop.xlane.xlu0 %920 }
 0x3b5   : > { %v923_v6 = vpop.xlane.xlu1 %922  ;;  %2399 = vrcp.f32 %v921_v56 }
 0x3b6   : > { %2401 = vrcp.f32 %v923_v6 }
 0x3b9   : > { %v2851_v7 = vpop.xlane.xlu1 %926 }
 0x3bd   : > { %v2853_v8 = vpop.xlane.xlu1 %930 }
 0x3c1   : > { %v2855_v11 = vpop.xlane.xlu1 %934 }
 0x3c5   : > { %v554_v46 = vpop.permute.xlu1 %553 }
 0x3c6   : > { %v558_v13 = vadd.f32 %v554_v46, %v2668_v26  ;;  %v559_v14 = vadd.f32 %v2666_v25, %v554_v46  ;;  %v556_v15 = vadd.f32 %v554_v46, %v2660_v23  ;;  %v557_v16 = vadd.f32 %v2658_v22, %v554_v46 }
 0x3c7   : > { %v560_v18 = vadd.f32 %v554_v46, %v2674_v29  ;;  %v561_v19 = vadd.f32 %v2672_v28, %v554_v46  ;;  %v562_v21 = vadd.f32 %v554_v46, %v2680_v32  ;;  %v563_v24 = vadd.f32 %v2678_v31, %v554_v46 }
 0x3c8   : > { %v2322_v30 = vpack.i.bf16 %v559_v14, %v558_v13  ;;  %v2317_v47 = vpack.i.bf16 %v557_v16, %v556_v15  ;;  %v564_v36 = vadd.f32 %v554_v46, %v2686_v35  ;;  %v565_v22 = vadd.f32 %v2684_v34, %v554_v46  ;;  %v2394_v34 = vpop.eup %2393 }
 0x3c9   : > { %v2327_v26 = vpack.i.bf16 %v561_v19, %v560_v18  ;;  %v2332_v48 = vpack.i.bf16 %v563_v24, %v562_v21  ;;  %v566_v23 = vadd.f32 %v554_v46, %v2692_v38  ;;  %v567_v25 = vadd.f32 %v2690_v37, %v554_v46 }
 0x3ca   : > { %2323 = vrot.lane.b32.xlu1 %v2322_v30, %s2505_s21  ;;  %2318 = vrot.lane.b32.xlu0 %v2317_v47, %s2505_s21  ;;  %v568_v28 = vadd.f32 %v554_v46, %v2698_v41  ;;  %v569_v29 = vadd.f32 %v2696_v40, %v554_v46  ;;  %v570_v31 = vadd.f32 %v554_v46, %v2704_v44  ;;  %v2396_v40 = vpop.eup %2395 }
 0x3cb   : > { %v571_v32 = vadd.f32 %v2702_v43, %v554_v46  ;;  %v2337_v35 = vpack.i.bf16 %v565_v22, %v564_v36  ;;  %v2342_v50 = vpack.i.bf16 %v567_v25, %v566_v23  ;;  %v2874_v37 = vmul.f32 %v2392_v54, %v2796_v3  ;;  %v925_v43 = vpop.xlane.xlu0 %924  ;;  %v2398_v61 = vpop.eup %2397 }
 0x3cc   : > { %v2347_v42 = vpack.i.bf16 %v569_v29, %v568_v28  ;;  %v2877_v38 = vmul.f32 %v2390_v51, %v2794_v2  ;;  %v2880_v41 = vmul.f32 %v2394_v34, %v2800_v10  ;;  %v2883_v44 = vmul.f32 %v2396_v40, %v2804_v17  ;;  %v2400_v62 = vpop.eup %2399 }
 0x3cd   : > { %v2352_v53 = vpack.i.bf16 %v571_v32, %v570_v31  ;;  %2403 = vrcp.f32 %v925_v43  ;;  %v962_v10 = vmul.f32 %v2398_v61, %v2806_v20  ;;  %v963_v63 = vmul.f32 %v2400_v62, %v2812_v27  ;;  %v2402_v17 = vpop.eup %2401 }
 0x3ce   : > { %2328 = vrot.lane.b32.xlu1 %v2327_v26, %s2505_s21  ;;  %2333 = vrot.lane.b32.xlu0 %v2332_v48, %s2505_s21  ;;  %v974_v60 = vadd.f32 %v2877_v38, %v2874_v37  ;;  %2405 = vrcp.f32 %v2851_v7  ;;  %v964_v6 = vmul.f32 %v2402_v17, %v2814_v49 }
 0x3cf   : > { %v929_v1 = vpop.xlane.xlu0 %928 }
 0x3d0   : > { %v975_v3 = vadd.f32 %v974_v60, %v2880_v41  ;;  %2407 = vrcp.f32 %v929_v1 }
 0x3d1   : > { %2409 = vrcp.f32 %v2853_v8 }
 0x3d2   : > { %2338 = vrot.lane.b32.xlu1 %v2337_v35, %s2505_s21  ;;  %2343 = vrot.lane.b32.xlu0 %v2342_v50, %s2505_s21  ;;  %v976_v2 = vadd.f32 %v975_v3, %v2883_v44 }
 0x3d3   : > { %v933_v12 = vpop.xlane.xlu0 %932 }
 0x3d4   : > { %v977_v4 = vadd.f32 %v976_v2, %v962_v10  ;;  %2411 = vrcp.f32 %v933_v12 }
 0x3d5   : > { %2413 = vrcp.f32 %v2855_v11 }
 0x3d6   : > { %2348 = vrot.lane.b32.xlu1 %v2347_v42, %s2505_s21  ;;  %2353 = vrot.lane.b32.xlu0 %v2352_v53, %s2505_s21  ;;  %v978_v5 = vadd.f32 %v977_v4, %v963_v63 }
 0x3d7   : > { %v2404_v9 = vpop.eup %2403  ;;  %v937_v16 = vpop.xlane.xlu0 %936 }
 0x3d8   : > { %v965_v46 = vmul.f32 %v2404_v9, %v2819_v33  ;;  %v979_v13 = vadd.f32 %v978_v5, %v964_v6  ;;  %v2406_v14 = vpop.eup %2405  ;;  %2415 = vrcp.f32 %v937_v16 }
 0x3d9   : > { %v966_v15 = vmul.f32 %v2406_v14, %v2821_v52 }
 0x3da   : > { %v980_v20 = vadd.f32 %v979_v13, %v965_v46  ;;  %v2408_v27 = vpop.eup %2407 }
 0x3db   : > { %v967_v7 = vmul.f32 %v2408_v27, %v2826_v55  ;;  %v2410_v19 = vpop.eup %2409  ;;  %v941_v21 = vpop.xlane.xlu0 %940 }
 0x3dc   : > { %v981_v18 = vadd.f32 %v980_v20, %v966_v15  ;;  %v968_v24 = vmul.f32 %v2410_v19, %v2828_v39  ;;  %2417 = vrcp.f32 %v941_v21 }
 0x3de   : > { %v982_v49 = vadd.f32 %v981_v18, %v967_v7  ;;  %v2412_v33 = vpop.eup %2411 }
 0x3df   : > { %v969_v8 = vmul.f32 %v2412_v33, %v2832_v57  ;;  %v2414_v52 = vpop.eup %2413 }
 0x3e0   : > { %v983_v47 = vadd.f32 %v982_v49, %v968_v24  ;;  %v970_v55 = vmul.f32 %v2414_v52, %v2834_v58 }
 0x3e2   : > { %v984_v36 = vadd.f32 %v983_v47, %v969_v8  ;;  %v2416_v26 = vpop.eup %2415 }
 0x3e3   : > { %v971_v11 = vmul.f32 %v2416_v26, %v2838_v45 }
 0x3e4   : > { %v985_v48 = vadd.f32 %v984_v36, %v970_v55 }
 0x3e6   : > { %v2418_v22 = vpop.eup %2417  ;;  %v986_v25 = vadd.f32 %v985_v48, %v971_v11  ;;  %v1270_v48 = vld [vmem:[%s3148_s3] sm:$0xff] }
 0x3e7   : > { %v973_v57 = vmul.f32 %v2418_v22, %v2841_v59  ;;  %v1271_v22 = vld [vmem:[%s3148_s3 + $0x8] sm:$0xff] }
 0x3f6   : > { %v939_v30 = vpop.xlane.xlu1 %938 }
 0x3f7   : > { %2419 = vrcp.f32 %v939_v30 }
 0x401   : > { %v2420_v23 = vpop.eup %2419 }
 0x402   : > { %v972_v39 = vmul.f32 %v2420_v23, %v2848_v0  ;;  %v2209_v23 = vpack.c.bf16 %v1271_v22, %v1270_v48 }
 0x404   : > { %v987_v28 = vadd.f32 %v986_v25, %v972_v39 }
 0x406   : > { %v988_v29 = vadd.f32 %v987_v28, %v973_v57 }
 0x408   : > { %v989_v31 = vrot.slane %v988_v29, 4 }
 0x40a   : > { %v990_v32 = vadd.f32 %v989_v31, %v988_v29 }
 0x40c   : > { %v991_v35 = vrot.slane %v990_v32, 2 }
 0x40e   : > { %v992_v50 = vadd.f32 %v991_v35, %v990_v32 }
 0x410   : > { %v993_v51 = vrot.slane %v992_v50, 1 }
 0x412   : > { %v994_v58 = vadd.f32 %v993_v51, %v992_v50 }
 0x414   : > { %v995_v42 = vadd.f32 1e-09, %v994_v58 }
 0x416   : > { %2421 = vrcp.f32 %v995_v42 }
 0x420   : > { %v2422_v45 = vpop.eup %2421 }
 0x421   : > { %v997_v53 = vmul.f32 %v2422_v45, %v2874_v37  ;;  %v998_v0 = vmul.f32 %v2422_v45, %v2877_v38  ;;  %v999_v59 = vmul.f32 %v2422_v45, %v2880_v41  ;;  %v1000_v54 = vmul.f32 %v2422_v45, %v2883_v44 }
 0x422   : > { %v1001_v56 = vmul.f32 %v2422_v45, %v962_v10  ;;  %v1002_v34 = vmul.f32 %v2422_v45, %v963_v63  ;;  %v1003_v40 = vmul.f32 %v2422_v45, %v964_v6  ;;  %v1004_v43 = vmul.f32 %v2422_v45, %v965_v46 }
 0x423   : > { %1013 = vxpose.xlu1.b32.start [1/16] %v997_v53, 128  ;;  %1474 = vst [vmem:[%s2911_s24] sm:$0xff] %v997_v53  ;;  %1475 = vst [vmem:[%s2911_s24 + $0x8] sm:$0xff] %v998_v0  ;;  %v1005_v37 = vmul.f32 %v2422_v45, %v966_v15  ;;  %v1006_v38 = vmul.f32 %v2422_v45, %v967_v7  ;;  %v1007_v41 = vmul.f32 %v2422_v45, %v968_v24 }
 0x424   : > { %1476 = vst [vmem:[%s2911_s24 + $0x10] sm:$0xff] %v999_v59  ;;  %1477 = vst [vmem:[%s2911_s24 + $0x18] sm:$0xff] %v1000_v54  ;;  %v2917_v44 = vmul.f32 %v2422_v45, %v969_v8  ;;  %v2923_v60 = vmul.f32 %v2422_v45, %v970_v55  ;;  %v2925_v3 = vmul.f32 %v2422_v45, %v971_v11 }
 0x425   : > { %1478 = vst [vmem:[%s2911_s24 + $0x20] sm:$0xff] %v1001_v56  ;;  %1479 = vst [vmem:[%s2911_s24 + $0x28] sm:$0xff] %v1002_v34  ;;  %v2927_v61 = vmul.f32 %v2422_v45, %v972_v39  ;;  %v2929_v2 = vmul.f32 %v2422_v45, %v973_v57 }
 0x426   : > { %1480 = vst [vmem:[%s2911_s24 + $0x30] sm:$0xff] %v1003_v40  ;;  %1481 = vst [vmem:[%s2911_s24 + $0x38] sm:$0xff] %v1004_v43 }
 0x427   : > { %1482 = vst [vmem:[%s2911_s24 + $0x40] sm:$0xff] %v1005_v37  ;;  %1483 = vst [vmem:[%s2911_s24 + $0x48] sm:$0xff] %v1006_v38  ;;  %1014 = vxpose.xlu1.b32.cont [2/16] %v998_v0, 128 }
 0x428   : > { %1484 = vst [vmem:[%s2911_s24 + $0x50] sm:$0xff] %v1007_v41  ;;  %1485 = vst [vmem:[%s2911_s24 + $0x58] sm:$0xff] %v2917_v44 }
 0x429   : > { %1486 = vst [vmem:[%s2911_s24 + $0x60] sm:$0xff] %v2923_v60  ;;  %1487 = vst [vmem:[%s2911_s24 + $0x68] sm:$0xff] %v2925_v3 }
 0x42a   : > { %1488 = vst [vmem:[%s2911_s24 + $0x70] sm:$0xff] %v2927_v61  ;;  %1489 = vst [vmem:[%s2911_s24 + $0x78] sm:$0xff] %v2929_v2  ;;  %s2443_s24 = sshll.u32 %s2506_s9, 4  ;;  %s2444_s24 = int_to_ptr.vmem [resolvable:$false] %s2443_s24 }
 0x42b   : > { %1015 = vxpose.xlu1.b32.cont [3/16] %v999_v59, 128  ;;  %s2445_s21 = scalar_lea.vmem %s2444_s24, 4096  ;;  %p2446_p0 = scmp.lt.s32.totalorder %s3000_s12, %s2444_s24 }
 0x42f   : > { %1016 = vxpose.xlu1.b32.cont [4/16] %v1000_v54, 128  ;;  %v1272_v54 = vld [vmem:[%s3148_s3 + $0x10] sm:$0xff] }
 0x433   : > { %1017 = vxpose.xlu1.b32.cont [5/16] %v1001_v56, 128  ;;  %v1273_v56 = vld [vmem:[%s3148_s3 + $0x18] sm:$0xff] }
 0x437   : > { %1018 = vxpose.xlu1.b32.cont [6/16] %v1002_v34, 128  ;;  %v2213_v34 = vpack.c.bf16 %v1273_v56, %v1272_v54 }
 0x43b   : > { %1019 = vxpose.xlu1.b32.cont [7/16] %v1003_v40, 128 }
 0x43c   : > { %v2319_v62 = vpop.permute.xlu0 %2318  ;;  %v2324_v10 = vpop.permute.xlu1 %2323 }
 0x43d   : > { %v2321_v63 = vunpack.i.h.bf16 %v2319_v62  ;;  %v2320_v1 = vunpack.i.l.bf16 %v2319_v62  ;;  %v2326_v4 = vunpack.i.h.bf16 %v2324_v10  ;;  %v2325_v17 = vunpack.i.l.bf16 %v2324_v10  ;;  %v2426_v62 = vld [vmem:[%s2624_s13 + $0x18] sm:$0xff] }
 0x43f   : > { %v2177_v5 = vpack.c.bf16 %v2321_v63, %v2320_v1  ;;  %1020 = vxpose.xlu1.b32.cont [8/16] %v1004_v43, 128  ;;  %v2181_v6 = vpack.c.bf16 %v2326_v4, %v2325_v17  ;;  %v2427_v4 = vld [vmem:[%s2624_s13 + $0x20] sm:$0xff] }
 0x440   : > { %v2329_v9 = vpop.permute.xlu1 %2328  ;;  %v2334_v13 = vpop.permute.xlu0 %2333 }
 0x441   : > { %v2331_v46 = vunpack.i.h.bf16 %v2329_v9  ;;  %v2330_v12 = vunpack.i.l.bf16 %v2329_v9  ;;  %2178 = vmatprep.subr.bf16.mxu0 %v2177_v5  ;;  %2217 = vmatprep.subr.bf16.mxu1 %v2177_v5  ;;  %v2336_v14 = vunpack.i.h.bf16 %v2334_v13  ;;  %v2335_v20 = vunpack.i.l.bf16 %v2334_v13 }
 0x442   : > { %2180 = vmatpush3.bf16.msra.mxu0 %v2177_v5  ;;  %2225 = vmatpush3.bf16.msra.mxu1 %v2177_v5  ;;  %v2428_v5 = vld [vmem:[%s2624_s13 + $0x28] sm:$0xff] }
 0x443   : > { %1021 = vxpose.xlu1.b32.cont [9/16] %v1005_v37, 128  ;;  %2182 = vmatprep.subr.bf16.mxu0 %v2181_v6  ;;  %v2185_v27 = vpack.c.bf16 %v2331_v46, %v2330_v12  ;;  %v2189_v16 = vpack.c.bf16 %v2336_v14, %v2335_v20  ;;  %v2423_v37 = vld [vmem:[%s2624_s13] sm:$0xff]  ;;  %v2429_v12 = vld [vmem:[%s2624_s13 + $0x30] sm:$0xff]  ;;  %v2430_v14 = vld [vmem:[%s2624_s13 + $0x38] sm:$0xff] }
 0x444   : > { %2218 = vmatprep.subr.bf16.mxu1 %v2181_v6  ;;  %v2339_v15 = vpop.permute.xlu1 %2338  ;;  %v2344_v19 = vpop.permute.xlu0 %2343 }
 0x445   : > { %v2341_v7 = vunpack.i.h.bf16 %v2339_v15  ;;  %v2340_v18 = vunpack.i.l.bf16 %v2339_v15  ;;  %v2346_v49 = vunpack.i.h.bf16 %v2344_v19  ;;  %v2345_v33 = vunpack.i.l.bf16 %v2344_v19 }
 0x446   : > { %2184 = vmatpush3.bf16.msra.mxu0 %v2181_v6  ;;  %2226 = vmatpush3.bf16.msra.mxu1 %v2181_v6 }
 0x447   : > { %1022 = vxpose.xlu1.b32.cont [10/16] %v1006_v38, 128  ;;  %2186 = vmatprep.subr.bf16.mxu0 %v2185_v27  ;;  %v2193_v21 = vpack.c.bf16 %v2341_v7, %v2340_v18  ;;  %v2197_v8 = vpack.c.bf16 %v2346_v49, %v2345_v33  ;;  %v2432_v18 = vld [vmem:[%s2624_s13 + $0x48] sm:$0xff] }
 0x448   : > { %2219 = vmatprep.subr.bf16.mxu1 %v2185_v27  ;;  %v2349_v24 = vpop.permute.xlu1 %2348  ;;  %v2354_v52 = vpop.permute.xlu0 %2353 }
 0x449   : > { %v2351_v30 = vunpack.i.h.bf16 %v2349_v24  ;;  %v2350_v47 = vunpack.i.l.bf16 %v2349_v24  ;;  %v2356_v36 = vunpack.i.h.bf16 %v2354_v52  ;;  %v2355_v26 = vunpack.i.l.bf16 %v2354_v52 }
 0x44a   : > { %2188 = vmatpush3.bf16.msra.mxu0 %v2185_v27  ;;  %2227 = vmatpush3.bf16.msra.mxu1 %v2185_v27 }
 0x44b   : > { %1023 = vxpose.xlu1.b32.cont [11/16] %v1007_v41, 128  ;;  %2190 = vmatprep.subr.bf16.mxu0 %v2189_v16  ;;  %v2201_v55 = vpack.c.bf16 %v2351_v30, %v2350_v47  ;;  %v2205_v11 = vpack.c.bf16 %v2356_v36, %v2355_v26  ;;  %v2424_v41 = vld [vmem:[%s2624_s13 + $0x8] sm:$0xff]  ;;  %v2435_v36 = vld [vmem:[%s2624_s13 + $0x60] sm:$0xff] }
 0x44c   : > { %2220 = vmatprep.subr.bf16.mxu1 %v2189_v16 }
 0x44e   : > { %2192 = vmatpush3.bf16.msra.mxu0 %v2189_v16  ;;  %2228 = vmatpush3.bf16.msra.mxu1 %v2189_v16  ;;  %v2431_v16 = vld [vmem:[%s2624_s13 + $0x40] sm:$0xff] }
 0x44f   : > { %1024 = vxpose.xlu1.b32.cont [12/16] %v2917_v44, 128  ;;  %2194 = vmatprep.subr.bf16.mxu0 %v2193_v21 }
 0x450   : > { %2221 = vmatprep.subr.bf16.mxu1 %v2193_v21 }
 0x452   : > { %2196 = vmatpush3.bf16.msra.mxu0 %v2193_v21  ;;  %2229 = vmatpush3.bf16.msra.mxu1 %v2193_v21  ;;  %v2433_v21 = vld [vmem:[%s2624_s13 + $0x50] sm:$0xff] }
 0x453   : > { %1025 = vxpose.xlu1.b32.cont [13/16] %v2923_v60, 128  ;;  %2198 = vmatprep.subr.bf16.mxu0 %v2197_v8 }
 0x454   : > { %2222 = vmatprep.subr.bf16.mxu1 %v2197_v8 }
 0x456   : > { %2200 = vmatpush3.bf16.msra.mxu0 %v2197_v8  ;;  %2230 = vmatpush3.bf16.msra.mxu1 %v2197_v8  ;;  %v2434_v8 = vld [vmem:[%s2624_s13 + $0x58] sm:$0xff] }
 0x457   : > { %1026 = vxpose.xlu1.b32.cont [14/16] %v2925_v3, 128  ;;  %2202 = vmatprep.subr.bf16.mxu0 %v2201_v55 }
 0x458   : > { %2223 = vmatprep.subr.bf16.mxu1 %v2201_v55 }
 0x45a   : > { %2204 = vmatpush3.bf16.msra.mxu0 %v2201_v55  ;;  %2231 = vmatpush3.bf16.msra.mxu1 %v2201_v55  ;;  %v2436_v55 = vld [vmem:[%s2624_s13 + $0x68] sm:$0xff] }
 0x45b   : > { %1027 = vxpose.xlu1.b32.cont [15/16] %v2927_v61, 128  ;;  %2206 = vmatprep.subr.bf16.mxu0 %v2205_v11  ;;  %v2425_v61 = vld [vmem:[%s2624_s13 + $0x10] sm:$0xff] }
 0x45c   : > { %2224 = vmatprep.subr.bf16.mxu1 %v2205_v11 }
 0x45e   : > { %2208 = vmatpush3.bf16.msra.mxu0 %v2205_v11  ;;  %2232 = vmatpush3.bf16.msra.mxu1 %v2205_v11 }
 0x45f   : > { %1028 = vxpose.xlu1.b32.end [16/16] %v2929_v2, 128  ;;  %2210 = vmatprep.subr.bf16.mxu0 %v2209_v23 }
 0x4a3   : > { %v1029_v39 = vpop.trf.xlu1 }
 0x4a4   : > { %2065 = vmatprep.mubr.f32.mxu0 %v1029_v39 }
 0x4a7   : > { %v1030_v25 = vpop.trf.xlu1 }
 0x4a8   : > { %2066 = vmatmul.mubr.f32.vlgmr.msra.gmra.mrb[16].mxu0 %v1030_v25  ;;  %v2438_v25 = vld [vmem:[%s2624_s13 + $0x78] sm:$0xff] }
 0x4a9   : > { %2212 = vmatpush3.bf16.msra.mxu0 %v2209_v23  ;;  %v2437_v23 = vld [vmem:[%s2624_s13 + $0x70] sm:$0xff]  ;;  %s2439_s13 = scalar_lea.vmem %s3000_s12, 2048 }
 0x4aa   : > { %2214 = vmatprep.subr.bf16.mxu0 %v2213_v34  ;;  %p2440_p11 = scmp.ne.s32.totalorder %s3000_s12, %s2439_s13  ;;  %p2447_p1 = scmp.lt.s32.totalorder %s2445_s21, %s2439_s13 }
 0x4ab   : > { %v1031_v57 = vpop.trf.xlu1 }
 0x4ac   : > { %2068 = vmatprep.mubr.f32.mxu0 %v1031_v57  ;;  %p2441_p12 = pnand %p2440_p11, %p2592_p5  ;;  %p2448_p2 = por %p2447_p1, %p2446_p0 }
 0x4ad   : > { %2216 = vmatpush3.bf16.msra.mxu0 %v2213_v34 }
 0x4ae   : > { %p2442_p13 = pneg %p2441_p12 }
 0x4af   : > { %v1032_v28 = vpop.trf.xlu1 }
 0x4b0   : > { %2069 = vmatmul.mubr.f32.gmra.mrb[18].mxu0 %v1032_v28  ;;  %p2449_p3 = pnand %p2448_p2, %p2442_p13 }
 0x4b3   : > { %v1033_v29 = vpop.trf.xlu1 }
 0x4b4   : > { %2071 = vmatprep.mubr.f32.mxu0 %v1033_v29 }
 0x4b7   : > { %v1034_v31 = vpop.trf.xlu1 }
 0x4b8   : > { %2072 = vmatmul.mubr.f32.gmra.mrb[20].mxu0 %v1034_v31 }
 0x4bb   : > { %v1035_v32 = vpop.trf.xlu1 }
 0x4bc   : > { %2074 = vmatprep.mubr.f32.mxu0 %v1035_v32 }
 0x4bf   : > { %v1036_v35 = vpop.trf.xlu1 }
 0x4c0   : > { %2075 = vmatmul.mubr.f32.gmra.mrb[22].mxu0 %v1036_v35 }
 0x4c3   : > { %v1037_v50 = vpop.trf.xlu1 }
 0x4c4   : > { %2077 = vmatprep.mubr.f32.mxu0 %v1037_v50 }
 0x4c7   : > { %v1038_v51 = vpop.trf.xlu1 }
 0x4c8   : > { %2078 = vmatmul.mubr.f32.gmra.mrb[24].mxu0 %v1038_v51 }
 0x4cb   : > { %v1039_v58 = vpop.trf.xlu1 }
 0x4cc   : > { %2080 = vmatprep.mubr.f32.mxu0 %v1039_v58 }
 0x4cf   : > { %v1040_v42 = vpop.trf.xlu1 }
 0x4d0   : > { %2081 = vmatmul.mubr.f32.gmra.mrb[26].mxu0 %v1040_v42 }
 0x4d3   : > { %v1041_v45 = vpop.trf.xlu1 }
 0x4d4   : > { %2083 = vmatprep.mubr.f32.mxu0 %v1041_v45 }
 0x4d7   : > { %v1042_v53 = vpop.trf.xlu1 }
 0x4d8   : > { %2084 = vmatmul.mubr.f32.gmra.mrb[28].mxu0 %v1042_v53 }
 0x4db   : > { %v1043_v0 = vpop.trf.xlu1 }
 0x4dc   : > { %2086 = vmatprep.mubr.f32.mxu1 %v1043_v0 }
 0x4df   : > { %v1044_v59 = vpop.trf.xlu1 }
 0x4e0   : > { %2087 = vmatmul.mubr.f32.vlgmr.msra.gmra.mrb[16].mxu1 %v1044_v59 }
 0x57b   : > { %v2067_v40 = vpop.f32.mrb[16].mxu0 }
 0x57c   : > { %v1175_v43 = vpop.f32.mrb[17].mxu0  ;;  %v1255_v44 = vsub.f32 %v2424_v41, %v2067_v40 }
 0x57d   : > { %v1254_v38 = vsub.f32 %v2423_v37, %v1175_v43 }
 0x57f   : > { %2097 = vmatprep.mubr.msk.f32.mxu0 %vm353_vm0, %v1254_v38 }
 0x580   : > { %2098 = vmatmul.mubr.msk.f32.vlgmr.msra.gmra.mrb[30].mxu0 %vm353_vm0, %v1255_v44 }
 0x583   : > { %v2070_v60 = vpop.f32.mrb[18].mxu0 }
 0x584   : > { %v1185_v3 = vpop.f32.mrb[19].mxu0  ;;  %v1257_v10 = vsub.f32 %v2426_v62, %v2070_v60 }
 0x585   : > { %v1256_v2 = vsub.f32 %v2425_v61, %v1185_v3 }
 0x587   : > { %2100 = vmatprep.mubr.msk.f32.mxu0 %vm353_vm0, %v1256_v2 }
 0x588   : > { %2101 = vmatmul.mubr.msk.f32.gmra.mrb[32].mxu0 %vm353_vm0, %v1257_v10 }
 0x58b   : > { %v2073_v63 = vpop.f32.mrb[20].mxu0 }
 0x58c   : > { %v1195_v1 = vpop.f32.mrb[21].mxu0  ;;  %v1259_v9 = vsub.f32 %v2428_v5, %v2073_v63 }
 0x58d   : > { %v1258_v17 = vsub.f32 %v2427_v4, %v1195_v1 }
 0x58f   : > { %2103 = vmatprep.mubr.msk.f32.mxu0 %vm353_vm0, %v1258_v17 }
 0x590   : > { %2104 = vmatmul.mubr.msk.f32.gmra.mrb[34].mxu0 %vm353_vm0, %v1259_v9 }
 0x593   : > { %v2076_v6 = vpop.f32.mrb[22].mxu0 }
 0x594   : > { %v1205_v46 = vpop.f32.mrb[23].mxu0  ;;  %v1261_v20 = vsub.f32 %v2430_v14, %v2076_v6 }
 0x595   : > { %v1260_v13 = vsub.f32 %v2429_v12, %v1205_v46 }
 0x597   : > { %2106 = vmatprep.mubr.msk.f32.mxu0 %vm353_vm0, %v1260_v13 }
 0x598   : > { %2107 = vmatmul.mubr.msk.f32.gmra.mrb[36].mxu0 %vm353_vm0, %v1261_v20 }
 0x59b   : > { %v2079_v27 = vpop.f32.mrb[24].mxu0 }
 0x59c   : > { %v1215_v15 = vpop.f32.mrb[25].mxu0  ;;  %v1263_v19 = vsub.f32 %v2432_v18, %v2079_v27 }
 0x59d   : > { %v1262_v7 = vsub.f32 %v2431_v16, %v1215_v15 }
 0x59f   : > { %2109 = vmatprep.mubr.msk.f32.mxu0 %vm353_vm0, %v1262_v7 }
 0x5a0   : > { %2110 = vmatmul.mubr.msk.f32.gmra.mrb[38].mxu0 %vm353_vm0, %v1263_v19 }
 0x5a3   : > { %v2082_v49 = vpop.f32.mrb[26].mxu0 }
 0x5a4   : > { %v1225_v33 = vpop.f32.mrb[27].mxu0  ;;  %v1265_v30 = vsub.f32 %v2434_v8, %v2082_v49 }
 0x5a5   : > { %v1264_v24 = vsub.f32 %v2433_v21, %v1225_v33 }
 0x5a7   : > { %2112 = vmatprep.mubr.msk.f32.mxu0 %vm353_vm0, %v1264_v24 }
 0x5a8   : > { %2113 = vmatmul.mubr.msk.f32.gmra.mrb[40].mxu0 %vm353_vm0, %v1265_v30 }
 0x5ab   : > { %v2085_v47 = vpop.f32.mrb[28].mxu0 }
 0x5ac   : > { %v1235_v52 = vpop.f32.mrb[29].mxu0  ;;  %v1267_v11 = vsub.f32 %v2436_v55, %v2085_v47 }
 0x5ad   : > { %v1266_v26 = vsub.f32 %v2435_v36, %v1235_v52 }
 0x5af   : > { %2115 = vmatprep.mubr.msk.f32.mxu0 %vm353_vm0, %v1266_v26 }
 0x5b0   : > { %2116 = vmatmul.mubr.msk.f32.gmra.mrb[42].mxu0 %vm353_vm0, %v1267_v11 }
 0x5b3   : > { %v2088_v48 = vpop.f32.mrb[16].mxu1 }
 0x5b4   : > { %v1245_v22 = vpop.f32.mrb[17].mxu1  ;;  %v1269_v57 = vsub.f32 %v2438_v25, %v2088_v48 }
 0x5b5   : > { %v1268_v39 = vsub.f32 %v2437_v23, %v1245_v22 }
 0x5b7   : > { %2118 = vmatprep.mubr.msk.f32.mxu0 %vm353_vm0, %v1268_v39 }
 0x5b8   : > { %2119 = vmatmul.mubr.msk.f32.gmra.mrb[44].mxu0 %vm353_vm0, %v1269_v57 }
 0x5b9   : > { %2452 = shalt.err (!%p2449_p3)
}
 0x5ba   : > { %s2453_s22 = scalar_lea.hbm %s2998_s19, 2048  ;;  %s2457_s17 = scalar_lea.hbm %s3150_s5, 4096 }
 0x5bb   : > { %p2454_p4 = scmp.ne.s32.totalorder %s2998_s19, %s2453_s22  ;;  %p2458_p9 = scmp.lt.u32.totalorder %s2998_s19, %s3150_s5 }
 0x5bc   : > { %p2459_p10 = scmp.lt.u32.totalorder %s2457_s17, %s2453_s22  ;;  %p2461_p12 = scmp.lt.u32.totalorder %s2453_s22, %s2998_s19 }
 0x5bd   : > { %p2455_p7 = pnand %p2454_p4, %p2592_p5 }
 0x5be   : > { %p2460_p11 = por %p2459_p10, %p2458_p9 }
 0x5bf   : > { %p2456_p8 = pneg %p2455_p7 }
 0x5c0   : > { %p2462_p13 = por %p2461_p12, %p2460_p11 }
 0x5c2   : > { %p2463_p0 = pnand %p2462_p13, %p2456_p8 }
 0x5c4   : > { %2466 = shalt.err (!%p2463_p0)
}
 0x5c5   : > { %s2507_s13 = smov 128   ;;  %s2508_s24 = smov 8   ;;  %v3031_v28 = vld [vmem:[%s3149_s4] ss:$0 sm:$0xff]  ;;  %vm1543_vm3 = vcmask 253952  }
 0x5c6   : > { %2233 = dma.vmem_to_hbm [thread:$0]  (%p2592_p5), %s3000_s12, 2048, %s2998_s19, %s3004_s20, %s2507_s13, %s2507_s13, %s2508_s24  }
 0x5c7   : > { %s3038_s17 = scalar_lea.vmem %s3151_s6, %s1838_s26  ;;  %s329_s12 = scalar_lea.vmem %s3152_s7, %s2616_s25 }
 0x5c8   : > { %s332_s18 = scalar_lea.vmem %s3153_s8, %s2616_s25 }
 0x653   : > { %v2099_v29 = vpop.f32.mrb[30].mxu0 }
 0x654   : > { %v1401_v31 = vadd.f32 %v2099_v29, %v3031_v28  ;;  %v1395_v32 = vpop.f32.mrb[31].mxu0 }
 0x655   : > { %v1396_v35 = vadd.f32 %v3031_v28, %v1395_v32 }
 0x656   : > { %1491 = vst.msk [vmem:[%s3038_s17 + $0x8] sm:$0xff] %vm353_vm0, %v1401_v31  ;;  %v1507_v50 = vsel %vm353_vm0, %v1401_v31, 0.0  ;;  %v1546_v51 = vmul.f32 %v1401_v31, %v1401_v31 }
 0x657   : > { %1490 = vst.msk [vmem:[%s3038_s17] sm:$0xff] %vm353_vm0, %v1396_v35  ;;  %v1506_v58 = vsel %vm353_vm0, %v1396_v35, 0.0  ;;  %v1545_v42 = vmul.f32 %v1396_v35, %v1396_v35 }
 0x658   : > { %v1562_v45 = vsel %vm353_vm0, %v1546_v51, 0.0  ;;  %v1508_v53 = vadd.f32 %v1507_v50, %v1506_v58 }
 0x659   : > { %v1561_v0 = vsel %vm353_vm0, %v1545_v42, 0.0 }
 0x65a   : > { %v1563_v59 = vadd.f32 %v1562_v45, %v1561_v0 }
 0x65b   : > { %v2102_v54 = vpop.f32.mrb[32].mxu0 }
 0x65c   : > { %v1411_v56 = vadd.f32 %v2102_v54, %v3031_v28  ;;  %v1405_v34 = vpop.f32.mrb[33].mxu0 }
 0x65d   : > { %v1406_v40 = vadd.f32 %v3031_v28, %v1405_v34 }
 0x65e   : > { %1493 = vst.msk [vmem:[%s3038_s17 + $0x18] sm:$0xff] %vm353_vm0, %v1411_v56  ;;  %v1548_v43 = vmul.f32 %v1411_v56, %v1411_v56  ;;  %v1511_v44 = vsel %vm353_vm0, %v1411_v56, 0.0 }
 0x65f   : > { %1492 = vst.msk [vmem:[%s3038_s17 + $0x10] sm:$0xff] %vm353_vm0, %v1406_v40  ;;  %v1509_v37 = vsel %vm353_vm0, %v1406_v40, 0.0  ;;  %v1547_v38 = vmul.f32 %v1406_v40, %v1406_v40 }
 0x660   : > { %v1510_v41 = vadd.f32 %v1509_v37, %v1508_v53  ;;  %v1566_v2 = vsel %vm353_vm0, %v1548_v43, 0.0 }
 0x661   : > { %v1564_v60 = vsel %vm353_vm0, %v1547_v38, 0.0 }
 0x662   : > { %v1565_v3 = vadd.f32 %v1564_v60, %v1563_v59  ;;  %v1512_v61 = vadd.f32 %v1511_v44, %v1510_v41 }
 0x663   : > { %v2105_v62 = vpop.f32.mrb[34].mxu0 }
 0x664   : > { %v1421_v10 = vadd.f32 %v2105_v62, %v3031_v28  ;;  %v1415_v63 = vpop.f32.mrb[35].mxu0  ;;  %v1567_v1 = vadd.f32 %v1566_v2, %v1565_v3 }
 0x665   : > { %v1416_v4 = vadd.f32 %v3031_v28, %v1415_v63 }
 0x666   : > { %1495 = vst.msk [vmem:[%s3038_s17 + $0x28] sm:$0xff] %vm353_vm0, %v1421_v10  ;;  %v1550_v17 = vmul.f32 %v1421_v10, %v1421_v10  ;;  %v1515_v46 = vsel %vm353_vm0, %v1421_v10, 0.0 }
 0x667   : > { %1494 = vst.msk [vmem:[%s3038_s17 + $0x20] sm:$0xff] %vm353_vm0, %v1416_v4  ;;  %v1513_v5 = vsel %vm353_vm0, %v1416_v4, 0.0  ;;  %v1549_v9 = vmul.f32 %v1416_v4, %v1416_v4 }
 0x668   : > { %v1514_v6 = vadd.f32 %v1513_v5, %v1512_v61  ;;  %v1570_v20 = vsel %vm353_vm0, %v1550_v17, 0.0 }
 0x669   : > { %v1568_v12 = vsel %vm353_vm0, %v1549_v9, 0.0 }
 0x66a   : > { %v1569_v13 = vadd.f32 %v1568_v12, %v1567_v1  ;;  %v1516_v14 = vadd.f32 %v1515_v46, %v1514_v6 }
 0x66b   : > { %v2108_v27 = vpop.f32.mrb[36].mxu0 }
 0x66c   : > { %v1431_v15 = vadd.f32 %v2108_v27, %v3031_v28  ;;  %v1425_v16 = vpop.f32.mrb[37].mxu0  ;;  %v1571_v7 = vadd.f32 %v1570_v20, %v1569_v13 }
 0x66d   : > { %v1426_v18 = vadd.f32 %v3031_v28, %v1425_v16 }
 0x66e   : > { %1497 = vst.msk [vmem:[%s3038_s17 + $0x38] sm:$0xff] %vm353_vm0, %v1431_v15  ;;  %v1552_v19 = vmul.f32 %v1431_v15, %v1431_v15  ;;  %v1519_v24 = vsel %vm353_vm0, %v1431_v15, 0.0 }
 0x66f   : > { %1496 = vst.msk [vmem:[%s3038_s17 + $0x30] sm:$0xff] %vm353_vm0, %v1426_v18  ;;  %v1517_v49 = vsel %vm353_vm0, %v1426_v18, 0.0  ;;  %v1551_v33 = vmul.f32 %v1426_v18, %v1426_v18 }
 0x670   : > { %v1518_v21 = vadd.f32 %v1517_v49, %v1516_v14  ;;  %v1574_v52 = vsel %vm353_vm0, %v1552_v19, 0.0 }
 0x671   : > { %v1572_v8 = vsel %vm353_vm0, %v1551_v33, 0.0 }
 0x672   : > { %v1573_v30 = vadd.f32 %v1572_v8, %v1571_v7  ;;  %v1520_v47 = vadd.f32 %v1519_v24, %v1518_v21 }
 0x673   : > { %v2111_v36 = vpop.f32.mrb[38].mxu0 }
 0x674   : > { %v1441_v26 = vadd.f32 %v2111_v36, %v3031_v28  ;;  %v1435_v55 = vpop.f32.mrb[39].mxu0  ;;  %v1575_v11 = vadd.f32 %v1574_v52, %v1573_v30 }
 0x675   : > { %v1436_v48 = vadd.f32 %v3031_v28, %v1435_v55 }
 0x676   : > { %1499 = vst.msk [vmem:[%s3038_s17 + $0x48] sm:$0xff] %vm353_vm0, %v1441_v26  ;;  %v1554_v22 = vmul.f32 %v1441_v26, %v1441_v26  ;;  %v1523_v57 = vsel %vm353_vm0, %v1441_v26, 0.0 }
 0x677   : > { %1498 = vst.msk [vmem:[%s3038_s17 + $0x40] sm:$0xff] %vm353_vm0, %v1436_v48  ;;  %v1521_v23 = vsel %vm353_vm0, %v1436_v48, 0.0  ;;  %v1553_v39 = vmul.f32 %v1436_v48, %v1436_v48 }
 0x678   : > { %v1522_v25 = vadd.f32 %v1521_v23, %v1520_v47  ;;  %v1578_v35 = vsel %vm353_vm0, %v1554_v22, 0.0 }
 0x679   : > { %v1576_v29 = vsel %vm353_vm0, %v1553_v39, 0.0 }
 0x67a   : > { %v1577_v31 = vadd.f32 %v1576_v29, %v1575_v11  ;;  %v1524_v32 = vadd.f32 %v1523_v57, %v1522_v25 }
 0x67b   : > { %v2114_v50 = vpop.f32.mrb[40].mxu0 }
 0x67c   : > { %v1451_v51 = vadd.f32 %v2114_v50, %v3031_v28  ;;  %v1445_v58 = vpop.f32.mrb[41].mxu0  ;;  %v1579_v42 = vadd.f32 %v1578_v35, %v1577_v31 }
 0x67d   : > { %v1446_v45 = vadd.f32 %v3031_v28, %v1445_v58 }
 0x67e   : > { %1501 = vst.msk [vmem:[%s3038_s17 + $0x58] sm:$0xff] %vm353_vm0, %v1451_v51  ;;  %v1556_v53 = vmul.f32 %v1451_v51, %v1451_v51  ;;  %v1527_v56 = vsel %vm353_vm0, %v1451_v51, 0.0 }
 0x67f   : > { %1500 = vst.msk [vmem:[%s3038_s17 + $0x50] sm:$0xff] %vm353_vm0, %v1446_v45  ;;  %v1525_v0 = vsel %vm353_vm0, %v1446_v45, 0.0  ;;  %v1555_v59 = vmul.f32 %v1446_v45, %v1446_v45 }
 0x680   : > { %v1526_v54 = vadd.f32 %v1525_v0, %v1524_v32  ;;  %v1582_v37 = vsel %vm353_vm0, %v1556_v53, 0.0 }
 0x681   : > { %v1580_v34 = vsel %vm353_vm0, %v1555_v59, 0.0 }
 0x682   : > { %v1581_v40 = vadd.f32 %v1580_v34, %v1579_v42  ;;  %v1528_v43 = vadd.f32 %v1527_v56, %v1526_v54 }
 0x683   : > { %v2117_v38 = vpop.f32.mrb[42].mxu0 }
 0x684   : > { %v1461_v41 = vadd.f32 %v2117_v38, %v3031_v28  ;;  %v1455_v44 = vpop.f32.mrb[43].mxu0  ;;  %v1583_v60 = vadd.f32 %v1582_v37, %v1581_v40 }
 0x685   : > { %v1456_v3 = vadd.f32 %v3031_v28, %v1455_v44 }
 0x686   : > { %1503 = vst.msk [vmem:[%s3038_s17 + $0x68] sm:$0xff] %vm353_vm0, %v1461_v41  ;;  %v1558_v61 = vmul.f32 %v1461_v41, %v1461_v41  ;;  %v1531_v63 = vsel %vm353_vm0, %v1461_v41, 0.0 }
 0x687   : > { %1502 = vst.msk [vmem:[%s3038_s17 + $0x60] sm:$0xff] %vm353_vm0, %v1456_v3  ;;  %v1529_v2 = vsel %vm353_vm0, %v1456_v3, 0.0  ;;  %v1557_v62 = vmul.f32 %v1456_v3, %v1456_v3 }
 0x688   : > { %v1530_v10 = vadd.f32 %v1529_v2, %v1528_v43  ;;  %v1586_v5 = vsel %vm353_vm0, %v1558_v61, 0.0 }
 0x689   : > { %v1584_v1 = vsel %vm353_vm0, %v1557_v62, 0.0 }
 0x68a   : > { %v1585_v4 = vadd.f32 %v1584_v1, %v1583_v60  ;;  %v1532_v17 = vadd.f32 %v1531_v63, %v1530_v10 }
 0x68b   : > { %v2120_v9 = vpop.f32.mrb[44].mxu0 }
 0x68c   : > { %v1471_v6 = vadd.f32 %v2120_v9, %v3031_v28  ;;  %v1465_v46 = vpop.f32.mrb[45].mxu0  ;;  %v1587_v12 = vadd.f32 %v1586_v5, %v1585_v4 }
 0x68d   : > { %v1466_v13 = vadd.f32 %v3031_v28, %v1465_v46 }
 0x68e   : > { %1505 = vst.msk [vmem:[%s3038_s17 + $0x78] sm:$0xff] %vm353_vm0, %v1471_v6  ;;  %v1560_v14 = vmul.f32 %v1471_v6, %v1471_v6  ;;  %v1535_v16 = vsel %vm353_vm0, %v1471_v6, 0.0 }
 0x68f   : > { %1504 = vst.msk [vmem:[%s3038_s17 + $0x70] sm:$0xff] %vm353_vm0, %v1466_v13  ;;  %v1533_v20 = vsel %vm353_vm0, %v1466_v13, 0.0  ;;  %v1559_v27 = vmul.f32 %v1466_v13, %v1466_v13 }
 0x690   : > { %v1534_v15 = vadd.f32 %v1533_v20, %v1532_v17  ;;  %v1590_v49 = vsel %vm353_vm0, %v1560_v14, 0.0 }
 0x691   : > { %v1588_v7 = vsel %vm353_vm0, %v1559_v27, 0.0 }
 0x692   : > { %v1536_v18 = vadd.f32 %v1535_v16, %v1534_v15  ;;  %v1589_v19 = vadd.f32 %v1588_v7, %v1587_v12 }
 0x694   : > { %v1537_v28 = vrot.slane %v1536_v18, 4  ;;  %v1591_v33 = vadd.f32 %v1590_v49, %v1589_v19 }
 0x696   : > { %v1538_v21 = vadd.f32 %v1537_v28, %v1536_v18  ;;  %v1592_v24 = vrot.slane %v1591_v33, 4 }
 0x698   : > { %v1539_v8 = vrot.slane %v1538_v21, 2  ;;  %v1593_v30 = vadd.f32 %v1592_v24, %v1591_v33 }
 0x69a   : > { %v1540_v47 = vadd.f32 %v1539_v8, %v1538_v21  ;;  %v1594_v52 = vrot.slane %v1593_v30, 2 }
 0x69c   : > { %v1541_v36 = vrot.slane %v1540_v47, 1  ;;  %v1595_v26 = vadd.f32 %v1594_v52, %v1593_v30 }
 0x69e   : > { %v1542_v55 = vadd.f32 %v1541_v36, %v1540_v47  ;;  %v1596_v11 = vrot.slane %v1595_v26, 1 }
 0x6a0   : > { %1544 = vst.msk [vmem:[%s329_s12] sm:$0x1] %vm1543_vm3, %v1542_v55  ;;  %v1597_v48 = vadd.f32 %v1596_v11, %v1595_v26 }
 0x6a2   : > { %1598 = vst.msk [vmem:[%s332_s18] sm:$0x1] %vm1543_vm3, %v1597_v48 }
 0x6a3 PF: > { %p2239_p5 = scmp.ge.s32.totalorder %s2501_s30, 2  ;;  %s1648_s9 = sand.u32 1, %s2489_s27  }
 0x6a4   : > { %s1649_s13 = scalar_lea.sflag [#allocation3], %s1648_s9 }
 0x6a5   : > { %p2236_p1 = pnand %p2239_p5, %p2596_p6 }
 0x6a7   : > { %2484 = dma.done.wait (!%p2236_p1), %s1649_s13, 2048  }
 0x6a8   : > { %2486 = vsyncadd (!%p2236_p1), %s1649_s13, 4294965248  ;;  %p19_p2 = scmp.ge.s32.totalorder %s2579_s11, 4   ;;  %s3158_s27 = smov %s2493_s28 }
 0x6a9   : > { %s3159_s28 = smov %s2497_s29  ;;  %s3160_s29 = smov %s2590_s14 }
 0x6aa   : > { %s3161_s30 = smov %s2579_s11  ;;  %21 = sbr.rel (!%p19_p2) target bundleno = 3 (0x3), region = 111 }
 0x6b1   :  { %1674 = vsyncpa [#allocation3], 1 }
 0x6b2   :  { %1676 = vsyncpa [#allocation3 + $0x1], 1 }

</bundles_post_ra>
